<compile_context>
chip_gen: v6e
topology: v6e:2x2x1
jax: 0.10.0
libtpu: 0.0.40
codegen_flags: <defaults>
</compile_context>

<pallas_src>
import functools

import jax
import jax.numpy as jnp
from jax.experimental import pallas as pl
from jax.experimental.pallas import tpu as pltpu


def rnn_recurrence_kernel(gx_ref, len_ref, whh_ref, w2_ref, b2_ref, out_ref,
                          *, hidden, vpu_epilogue):
    # gx_ref:  (T, Bt, 4H)  precomputed input-side gate pre-activations (+ biases)
    # len_ref: (Bt, 1) int32 valid lengths
    # whh_ref: (H, 4H)      recurrent weight, gate-major columns [i, f, o, g]
    # w2_ref:  (1, H) if vpu_epilogue else (H, Cout); b2_ref: (1, Cout)
    # out_ref: (Bt, Cout)
    T = gx_ref.shape[0]
    Bt = gx_ref.shape[1]
    H = hidden

    # Loop-invariant operands: load once, close over them (no per-step re-loads).
    whh = whh_ref[...]       # (H, 4H)
    lens = len_ref[...]      # (Bt, 1)

    h0 = jnp.zeros((Bt, H), jnp.float32)
    c0 = jnp.zeros((Bt, H), jnp.float32)

    def step(t, carry):
        h, c = carry
        # Only the recurrent matmul remains on the serial path.
        gates = gx_ref[t] + jnp.dot(h, whh, preferred_element_type=jnp.float32)
        # Gate columns were permuted in the wrapper to [i, f, o, g]:
        sig = jax.nn.sigmoid(gates[:, :3 * H])        # i, f, o in one EUP pass
        g_g = jnp.tanh(gates[:, 3 * H:])
        i_g = sig[:, 0:H]
        f_g = sig[:, H:2 * H]
        o_g = sig[:, 2 * H:3 * H]
        c_new = f_g * c + i_g * g_g
        h_new = o_g * jnp.tanh(c_new)
        # pack_padded_sequence semantics: state only advances while t < length.
        valid = t < lens                              # (Bt, 1), broadcasts over H
        h = jnp.where(valid, h_new, h)
        c = jnp.where(valid, c_new, c)
        return h, c

    h, _ = jax.lax.fori_loop(0, T, step, (h0, c0), unroll=True)

    if vpu_epilogue:
        # Cout == 1: per-row dot product as VPU multiply + lane reduce (no MXU).
        out_ref[...] = (jnp.sum(h * w2_ref[...], axis=1, keepdims=True)
                        + b2_ref[...])
    else:
        out_ref[...] = (jnp.dot(h, w2_ref[...],
                                preferred_element_type=jnp.float32)
                        + b2_ref[...])


def _permute_gate_cols(w):
    """Reorder 4H gate columns from PyTorch [i, f, g, o] to [i, f, o, g]."""
    i, f, g, o = jnp.split(w, 4, axis=-1)
    return jnp.concatenate([i, f, o, g], axis=-1)


@functools.partial(jax.jit, static_argnames=("clip_num",))
def rnn_forward(x, length, params, clip_num=5):
    """x: (B, T, Cin) float32 (batch_first, like PyTorch); length: (B,) int."""
    del clip_num  # chunk/cat over the batch is a no-op on the math
    B, T, Cin = x.shape
    H = params["w1"].shape[1]
    Cout = params["w2"].shape[1]

    # ---- fold layer1 into the LSTM input projection (tiny, done per call) ----
    wih = _permute_gate_cols(params["wih"])            # (H, 4H)
    whh = _permute_gate_cols(params["whh"])            # (H, 4H)
    b = _permute_gate_cols(params["b"])                # (1, 4H)
    wg = params["w1"] @ wih                            # (Cin, 4H)
    bg = params["b1"] @ wih + b                        # (1, 4H)

    # ---- one lane-dense matmul for the whole input side (all T timesteps) ----
    # gates_x[t, b, :] = layer1(x[b, t]) @ W_ih + b_ih + b_hh
    gates_x = (jnp.einsum("btc,cg->tbg", x, wg,
                          preferred_element_type=jnp.float32)
               + bg[None])                             # (T, B, 4H)

    # ---- pad batch to a multiple of 8 sublanes; tile it over a parallel grid ----
    Bt = 8
    nb = pl.cdiv(B, Bt)
    B_pad = nb * Bt
    gates_x = jnp.pad(gates_x, ((0, 0), (0, B_pad - B), (0, 0)))
    lens = jnp.pad(length.astype(jnp.int32), (0, B_pad - B)).reshape(B_pad, 1)

    vpu_epilogue = (Cout == 1)
    if vpu_epilogue:
        w2 = params["w2"].T                            # (1, H)
        w2_block = (1, H)
    else:
        w2 = params["w2"]                              # (H, Cout)
        w2_block = (H, Cout)

    kernel = functools.partial(rnn_recurrence_kernel, hidden=H,
                               vpu_epilogue=vpu_epilogue)

    out = pl.pallas_call(
        kernel,
        out_shape=jax.ShapeDtypeStruct((B_pad, Cout), jnp.float32),
        grid=(nb,),
        in_specs=[
            pl.BlockSpec((T, Bt, 4 * H), lambda i: (0, i, 0)),
            pl.BlockSpec((Bt, 1), lambda i: (i, 0)),
            pl.BlockSpec((H, 4 * H), lambda i: (0, 0)),
            pl.BlockSpec(w2_block, lambda i: (0, 0)),
            pl.BlockSpec((1, Cout), lambda i: (0, 0)),
        ],
        out_specs=pl.BlockSpec((Bt, Cout), lambda i: (i, 0)),
        compiler_params=pltpu.CompilerParams(
            dimension_semantics=("parallel",)),
    )(gates_x, lens, whh, w2, params["b2"])

    out = out[:B]
    # PyTorch: out = layer2(ht).squeeze(0); out = out.squeeze(-1)
    if Cout == 1:
        out = out[:, 0]
    return out


def rnn_reference(x, length, params):
    """Pure-JAX reference mirroring the PyTorch forward (for verification)."""
    B, T, Cin = x.shape
    H = params["w1"].shape[1]
    sx = jnp.einsum("btc,ch->bth", x, params["w1"]) + params["b1"]
    h = jnp.zeros((B, H), jnp.float32)
    c = jnp.zeros((B, H), jnp.float32)
    for t in range(T):
        gates = sx[:, t] @ params["wih"] + h @ params["whh"] + params["b"]
        i = jax.nn.sigmoid(gates[:, 0:H])
        f = jax.nn.sigmoid(gates[:, H:2 * H])
        g = jnp.tanh(gates[:, 2 * H:3 * H])
        o = jax.nn.sigmoid(gates[:, 3 * H:4 * H])
        c_new = f * c + i * g
        h_new = o * jnp.tanh(c_new)
        m = (t < length)[:, None]
        h = jnp.where(m, h_new, h)
        c = jnp.where(m, c_new, c)
    out = h @ params["w2"] + params["b2"]
    return out[:, 0] if params["w2"].shape[1] == 1 else out


def init_params(key, inout_channel, hidden_channel):
    """Deterministic synthetic parameters matching the nn.Module shapes
    (stored pre-transposed: (in, out)); LSTM biases pre-summed (b_ih + b_hh)."""
    H, C = hidden_channel, inout_channel
    ks = jax.random.split(key, 7)
    s = 1.0 / jnp.sqrt(jnp.float32(H))
    u = lambda k, shp: jax.random.uniform(k, shp, jnp.float32, -s, s)
    return {
        "w1": u(ks[0], (C, H)),            # torch layer1.weight (H, C) ^T
        "b1": u(ks[1], (1, H)),            # torch layer1.bias
        "wih": u(ks[2], (H, 4 * H)),       # torch weight_ih_l0 (4H, H) ^T
        "whh": u(ks[3], (H, 4 * H)),       # torch weight_hh_l0 (4H, H) ^T
        "b": u(ks[4], (1, 4 * H)) + u(ks[5], (1, 4 * H)),  # bias_ih + bias_hh
        "w2": u(ks[6], (H, C)),            # torch layer2.weight (C, H) ^T
        "b2": jnp.zeros((1, C), jnp.float32),
    }


if __name__ == "__main__":
    key = jax.random.PRNGKey(0)
    k_par, k_x, k_len = jax.random.split(key, 3)

    B, T, Cin, H = 10, 12, 1, 32  # clip_num=5 chunks of 2 sequences each
    params = init_params(k_par, inout_channel=Cin, hidden_channel=H)

    x = jax.random.uniform(k_x, (B, T, Cin), jnp.float32, -1.0, 1.0)
    length = jax.random.randint(k_len, (B,), 1, T + 1, dtype=jnp.int32)
    # zero out padded tail (as the torch training loop does)
    tmask = (jnp.arange(T)[None, :] < length[:, None])[..., None]
    x = x * tmask.astype(x.dtype)

    out = rnn_forward(x, length, params, clip_num=5)
    out = jax.block_until_ready(out)

    ref = rnn_reference(x, length, params)
    assert out.shape == (B,), out.shape
    assert jnp.allclose(out, ref, atol=1e-4, rtol=1e-4), (out, ref)
    print("KERNEL_OK")
</pallas_src>

<mosaic_0001>
module attributes {stable_mosaic.version = 11 : i64} {
  func.func @rnn_recurrence_kernel(%arg0: i32, %arg1: memref<12x8x128xf32, #tpu.memory_space<vmem>>, %arg2: memref<8x1xi32, #tpu.memory_space<vmem>>, %arg3: memref<32x128xf32, #tpu.memory_space<vmem>>, %arg4: memref<1x32xf32, #tpu.memory_space<vmem>>, %arg5: memref<1x1xf32, #tpu.memory_space<vmem>>, %arg6: memref<8x1xf32, #tpu.memory_space<vmem>>) attributes {dimension_semantics = [#tpu.dimension_semantics<parallel>], iteration_bounds = array<i64: 2>, scalar_prefetch = 0 : i64, scratch_operands = 0 : i64, tpu.core_type = #tpu.core_type<tc>, window_params = [{transform_indices = @transform_0, window_bounds = array<i64: 12, 8, 128>}, {transform_indices = @transform_1, window_bounds = array<i64: 8, 1>}, {pipeline_mode = #tpu.pipeline_mode<synchronous>, transform_indices = @transform_2, window_bounds = array<i64: 32, 128>}, {pipeline_mode = #tpu.pipeline_mode<synchronous>, transform_indices = @transform_3, window_bounds = array<i64: 1, 32>}, {pipeline_mode = #tpu.pipeline_mode<synchronous>, transform_indices = @transform_4, window_bounds = array<i64: 1, 1>}, {transform_indices = @transform_5, window_bounds = array<i64: 8, 1>}]} {
    %c0 = arith.constant 0 : index
    %c0_0 = arith.constant 0 : index
    %0 = vector.load %arg3[%c0, %c0_0] : memref<32x128xf32, #tpu.memory_space<vmem>>, vector<32x128xf32>
    %c0_1 = arith.constant 0 : index
    %c0_2 = arith.constant 0 : index
    %1 = vector.load %arg2[%c0_1, %c0_2] : memref<8x1xi32, #tpu.memory_space<vmem>>, vector<8x1xi32>
    %cst = arith.constant 0.000000e+00 : f32
    %2 = vector.broadcast %cst : f32 to vector<8x32xf32>
    %cst_3 = arith.constant 0.000000e+00 : f32
    %3 = vector.broadcast %cst_3 : f32 to vector<8x32xf32>
    %c0_i32 = arith.constant 0 : i32
    %4 = arith.index_cast %c0_i32 : i32 to index
    %c0_4 = arith.constant 0 : index
    %c0_5 = arith.constant 0 : index
    %5 = vector.load %arg1[%4, %c0_4, %c0_5] : memref<12x8x128xf32, #tpu.memory_space<vmem>>, vector<1x8x128xf32>
    %6 = vector.shape_cast %5 : vector<1x8x128xf32> to vector<8x128xf32>
    %cst_6 = arith.constant dense<0.000000e+00> : vector<8x128xf32>
    %7 = tpu.matmul %2, %0, %cst_6 {dimension_numbers = #tpu.dot_dimension_numbers<[1], [0], [0], [1], [0, 0, 1, 1], [], []>} : vector<8x32xf32>, vector<32x128xf32>, vector<8x128xf32> -> vector<8x128xf32>
    %8 = arith.addf %6, %7 : vector<8x128xf32>
    %9 = vector.extract_strided_slice %8 {offsets = [0, 0], sizes = [8, 96], strides = [1, 1]} : vector<8x128xf32> to vector<8x96xf32>
    %10 = arith.negf %9 : vector<8x96xf32>
    %11 = math.exp %10 : vector<8x96xf32>
    %cst_7 = arith.constant 1.000000e+00 : f32
    %12 = vector.broadcast %cst_7 : f32 to vector<8x96xf32>
    %13 = arith.addf %12, %11 : vector<8x96xf32>
    %14 = arith.divf %12, %13 : vector<8x96xf32>
    %15 = vector.extract_strided_slice %8 {offsets = [0, 96], sizes = [8, 32], strides = [1, 1]} : vector<8x128xf32> to vector<8x32xf32>
    %16 = math.tanh %15 : vector<8x32xf32>
    %17 = vector.extract_strided_slice %14 {offsets = [0, 0], sizes = [8, 32], strides = [1, 1]} : vector<8x96xf32> to vector<8x32xf32>
    %18 = vector.extract_strided_slice %14 {offsets = [0, 32], sizes = [8, 32], strides = [1, 1]} : vector<8x96xf32> to vector<8x32xf32>
    %19 = vector.extract_strided_slice %14 {offsets = [0, 64], sizes = [8, 32], strides = [1, 1]} : vector<8x96xf32> to vector<8x32xf32>
    %20 = arith.mulf %18, %3 : vector<8x32xf32>
    %21 = arith.mulf %17, %16 : vector<8x32xf32>
    %22 = arith.addf %20, %21 : vector<8x32xf32>
    %23 = math.tanh %22 : vector<8x32xf32>
    %24 = arith.mulf %19, %23 : vector<8x32xf32>
    %25 = vector.broadcast %c0_i32 : i32 to vector<8x1xi32>
    %26 = arith.cmpi slt, %25, %1 : vector<8x1xi32>
    %27 = vector.shape_cast %26 : vector<8x1xi1> to vector<8x1xi1>
    %28 = vector.broadcast %27 : vector<8x1xi1> to vector<8x32xi1>
    %29 = arith.select %28, %24, %2 : vector<8x32xi1>, vector<8x32xf32>
    %30 = vector.shape_cast %26 : vector<8x1xi1> to vector<8x1xi1>
    %31 = vector.broadcast %30 : vector<8x1xi1> to vector<8x32xi1>
    %32 = arith.select %31, %22, %3 : vector<8x32xi1>, vector<8x32xf32>
    %c1_i32 = arith.constant 1 : i32
    %33 = arith.index_cast %c1_i32 : i32 to index
    %c0_8 = arith.constant 0 : index
    %c0_9 = arith.constant 0 : index
    %34 = vector.load %arg1[%33, %c0_8, %c0_9] : memref<12x8x128xf32, #tpu.memory_space<vmem>>, vector<1x8x128xf32>
    %35 = vector.shape_cast %34 : vector<1x8x128xf32> to vector<8x128xf32>
    %cst_10 = arith.constant dense<0.000000e+00> : vector<8x128xf32>
    %36 = tpu.matmul %29, %0, %cst_10 {dimension_numbers = #tpu.dot_dimension_numbers<[1], [0], [0], [1], [0, 0, 1, 1], [], []>} : vector<8x32xf32>, vector<32x128xf32>, vector<8x128xf32> -> vector<8x128xf32>
    %37 = arith.addf %35, %36 : vector<8x128xf32>
    %38 = vector.extract_strided_slice %37 {offsets = [0, 0], sizes = [8, 96], strides = [1, 1]} : vector<8x128xf32> to vector<8x96xf32>
    %39 = arith.negf %38 : vector<8x96xf32>
    %40 = math.exp %39 : vector<8x96xf32>
    %cst_11 = arith.constant 1.000000e+00 : f32
    %41 = vector.broadcast %cst_11 : f32 to vector<8x96xf32>
    %42 = arith.addf %41, %40 : vector<8x96xf32>
    %43 = arith.divf %41, %42 : vector<8x96xf32>
    %44 = vector.extract_strided_slice %37 {offsets = [0, 96], sizes = [8, 32], strides = [1, 1]} : vector<8x128xf32> to vector<8x32xf32>
    %45 = math.tanh %44 : vector<8x32xf32>
    %46 = vector.extract_strided_slice %43 {offsets = [0, 0], sizes = [8, 32], strides = [1, 1]} : vector<8x96xf32> to vector<8x32xf32>
    %47 = vector.extract_strided_slice %43 {offsets = [0, 32], sizes = [8, 32], strides = [1, 1]} : vector<8x96xf32> to vector<8x32xf32>
    %48 = vector.extract_strided_slice %43 {offsets = [0, 64], sizes = [8, 32], strides = [1, 1]} : vector<8x96xf32> to vector<8x32xf32>
    %49 = arith.mulf %47, %32 : vector<8x32xf32>
    %50 = arith.mulf %46, %45 : vector<8x32xf32>
    %51 = arith.addf %49, %50 : vector<8x32xf32>
    %52 = math.tanh %51 : vector<8x32xf32>
    %53 = arith.mulf %48, %52 : vector<8x32xf32>
    %54 = vector.broadcast %c1_i32 : i32 to vector<8x1xi32>
    %55 = arith.cmpi slt, %54, %1 : vector<8x1xi32>
    %56 = vector.shape_cast %55 : vector<8x1xi1> to vector<8x1xi1>
    %57 = vector.broadcast %56 : vector<8x1xi1> to vector<8x32xi1>
    %58 = arith.select %57, %53, %29 : vector<8x32xi1>, vector<8x32xf32>
    %59 = vector.shape_cast %55 : vector<8x1xi1> to vector<8x1xi1>
    %60 = vector.broadcast %59 : vector<8x1xi1> to vector<8x32xi1>
    %61 = arith.select %60, %51, %32 : vector<8x32xi1>, vector<8x32xf32>
    %c2_i32 = arith.constant 2 : i32
    %62 = arith.index_cast %c2_i32 : i32 to index
    %c0_12 = arith.constant 0 : index
    %c0_13 = arith.constant 0 : index
    %63 = vector.load %arg1[%62, %c0_12, %c0_13] : memref<12x8x128xf32, #tpu.memory_space<vmem>>, vector<1x8x128xf32>
    %64 = vector.shape_cast %63 : vector<1x8x128xf32> to vector<8x128xf32>
    %cst_14 = arith.constant dense<0.000000e+00> : vector<8x128xf32>
    %65 = tpu.matmul %58, %0, %cst_14 {dimension_numbers = #tpu.dot_dimension_numbers<[1], [0], [0], [1], [0, 0, 1, 1], [], []>} : vector<8x32xf32>, vector<32x128xf32>, vector<8x128xf32> -> vector<8x128xf32>
    %66 = arith.addf %64, %65 : vector<8x128xf32>
    %67 = vector.extract_strided_slice %66 {offsets = [0, 0], sizes = [8, 96], strides = [1, 1]} : vector<8x128xf32> to vector<8x96xf32>
    %68 = arith.negf %67 : vector<8x96xf32>
    %69 = math.exp %68 : vector<8x96xf32>
    %cst_15 = arith.constant 1.000000e+00 : f32
    %70 = vector.broadcast %cst_15 : f32 to vector<8x96xf32>
    %71 = arith.addf %70, %69 : vector<8x96xf32>
    %72 = arith.divf %70, %71 : vector<8x96xf32>
    %73 = vector.extract_strided_slice %66 {offsets = [0, 96], sizes = [8, 32], strides = [1, 1]} : vector<8x128xf32> to vector<8x32xf32>
    %74 = math.tanh %73 : vector<8x32xf32>
    %75 = vector.extract_strided_slice %72 {offsets = [0, 0], sizes = [8, 32], strides = [1, 1]} : vector<8x96xf32> to vector<8x32xf32>
    %76 = vector.extract_strided_slice %72 {offsets = [0, 32], sizes = [8, 32], strides = [1, 1]} : vector<8x96xf32> to vector<8x32xf32>
    %77 = vector.extract_strided_slice %72 {offsets = [0, 64], sizes = [8, 32], strides = [1, 1]} : vector<8x96xf32> to vector<8x32xf32>
    %78 = arith.mulf %76, %61 : vector<8x32xf32>
    %79 = arith.mulf %75, %74 : vector<8x32xf32>
    %80 = arith.addf %78, %79 : vector<8x32xf32>
    %81 = math.tanh %80 : vector<8x32xf32>
    %82 = arith.mulf %77, %81 : vector<8x32xf32>
    %83 = vector.broadcast %c2_i32 : i32 to vector<8x1xi32>
    %84 = arith.cmpi slt, %83, %1 : vector<8x1xi32>
    %85 = vector.shape_cast %84 : vector<8x1xi1> to vector<8x1xi1>
    %86 = vector.broadcast %85 : vector<8x1xi1> to vector<8x32xi1>
    %87 = arith.select %86, %82, %58 : vector<8x32xi1>, vector<8x32xf32>
    %88 = vector.shape_cast %84 : vector<8x1xi1> to vector<8x1xi1>
    %89 = vector.broadcast %88 : vector<8x1xi1> to vector<8x32xi1>
    %90 = arith.select %89, %80, %61 : vector<8x32xi1>, vector<8x32xf32>
    %c3_i32 = arith.constant 3 : i32
    %91 = arith.index_cast %c3_i32 : i32 to index
    %c0_16 = arith.constant 0 : index
    %c0_17 = arith.constant 0 : index
    %92 = vector.load %arg1[%91, %c0_16, %c0_17] : memref<12x8x128xf32, #tpu.memory_space<vmem>>, vector<1x8x128xf32>
    %93 = vector.shape_cast %92 : vector<1x8x128xf32> to vector<8x128xf32>
    %cst_18 = arith.constant dense<0.000000e+00> : vector<8x128xf32>
    %94 = tpu.matmul %87, %0, %cst_18 {dimension_numbers = #tpu.dot_dimension_numbers<[1], [0], [0], [1], [0, 0, 1, 1], [], []>} : vector<8x32xf32>, vector<32x128xf32>, vector<8x128xf32> -> vector<8x128xf32>
    %95 = arith.addf %93, %94 : vector<8x128xf32>
    %96 = vector.extract_strided_slice %95 {offsets = [0, 0], sizes = [8, 96], strides = [1, 1]} : vector<8x128xf32> to vector<8x96xf32>
    %97 = arith.negf %96 : vector<8x96xf32>
    %98 = math.exp %97 : vector<8x96xf32>
    %cst_19 = arith.constant 1.000000e+00 : f32
    %99 = vector.broadcast %cst_19 : f32 to vector<8x96xf32>
    %100 = arith.addf %99, %98 : vector<8x96xf32>
    %101 = arith.divf %99, %100 : vector<8x96xf32>
    %102 = vector.extract_strided_slice %95 {offsets = [0, 96], sizes = [8, 32], strides = [1, 1]} : vector<8x128xf32> to vector<8x32xf32>
    %103 = math.tanh %102 : vector<8x32xf32>
    %104 = vector.extract_strided_slice %101 {offsets = [0, 0], sizes = [8, 32], strides = [1, 1]} : vector<8x96xf32> to vector<8x32xf32>
    %105 = vector.extract_strided_slice %101 {offsets = [0, 32], sizes = [8, 32], strides = [1, 1]} : vector<8x96xf32> to vector<8x32xf32>
    %106 = vector.extract_strided_slice %101 {offsets = [0, 64], sizes = [8, 32], strides = [1, 1]} : vector<8x96xf32> to vector<8x32xf32>
    %107 = arith.mulf %105, %90 : vector<8x32xf32>
    %108 = arith.mulf %104, %103 : vector<8x32xf32>
    %109 = arith.addf %107, %108 : vector<8x32xf32>
    %110 = math.tanh %109 : vector<8x32xf32>
    %111 = arith.mulf %106, %110 : vector<8x32xf32>
    %112 = vector.broadcast %c3_i32 : i32 to vector<8x1xi32>
    %113 = arith.cmpi slt, %112, %1 : vector<8x1xi32>
    %114 = vector.shape_cast %113 : vector<8x1xi1> to vector<8x1xi1>
    %115 = vector.broadcast %114 : vector<8x1xi1> to vector<8x32xi1>
    %116 = arith.select %115, %111, %87 : vector<8x32xi1>, vector<8x32xf32>
    %117 = vector.shape_cast %113 : vector<8x1xi1> to vector<8x1xi1>
    %118 = vector.broadcast %117 : vector<8x1xi1> to vector<8x32xi1>
    %119 = arith.select %118, %109, %90 : vector<8x32xi1>, vector<8x32xf32>
    %c4_i32 = arith.constant 4 : i32
    %120 = arith.index_cast %c4_i32 : i32 to index
    %c0_20 = arith.constant 0 : index
    %c0_21 = arith.constant 0 : index
    %121 = vector.load %arg1[%120, %c0_20, %c0_21] : memref<12x8x128xf32, #tpu.memory_space<vmem>>, vector<1x8x128xf32>
    %122 = vector.shape_cast %121 : vector<1x8x128xf32> to vector<8x128xf32>
    %cst_22 = arith.constant dense<0.000000e+00> : vector<8x128xf32>
    %123 = tpu.matmul %116, %0, %cst_22 {dimension_numbers = #tpu.dot_dimension_numbers<[1], [0], [0], [1], [0, 0, 1, 1], [], []>} : vector<8x32xf32>, vector<32x128xf32>, vector<8x128xf32> -> vector<8x128xf32>
    %124 = arith.addf %122, %123 : vector<8x128xf32>
    %125 = vector.extract_strided_slice %124 {offsets = [0, 0], sizes = [8, 96], strides = [1, 1]} : vector<8x128xf32> to vector<8x96xf32>
    %126 = arith.negf %125 : vector<8x96xf32>
    %127 = math.exp %126 : vector<8x96xf32>
    %cst_23 = arith.constant 1.000000e+00 : f32
    %128 = vector.broadcast %cst_23 : f32 to vector<8x96xf32>
    %129 = arith.addf %128, %127 : vector<8x96xf32>
    %130 = arith.divf %128, %129 : vector<8x96xf32>
    %131 = vector.extract_strided_slice %124 {offsets = [0, 96], sizes = [8, 32], strides = [1, 1]} : vector<8x128xf32> to vector<8x32xf32>
    %132 = math.tanh %131 : vector<8x32xf32>
    %133 = vector.extract_strided_slice %130 {offsets = [0, 0], sizes = [8, 32], strides = [1, 1]} : vector<8x96xf32> to vector<8x32xf32>
    %134 = vector.extract_strided_slice %130 {offsets = [0, 32], sizes = [8, 32], strides = [1, 1]} : vector<8x96xf32> to vector<8x32xf32>
    %135 = vector.extract_strided_slice %130 {offsets = [0, 64], sizes = [8, 32], strides = [1, 1]} : vector<8x96xf32> to vector<8x32xf32>
    %136 = arith.mulf %134, %119 : vector<8x32xf32>
    %137 = arith.mulf %133, %132 : vector<8x32xf32>
    %138 = arith.addf %136, %137 : vector<8x32xf32>
    %139 = math.tanh %138 : vector<8x32xf32>
    %140 = arith.mulf %135, %139 : vector<8x32xf32>
    %141 = vector.broadcast %c4_i32 : i32 to vector<8x1xi32>
    %142 = arith.cmpi slt, %141, %1 : vector<8x1xi32>
    %143 = vector.shape_cast %142 : vector<8x1xi1> to vector<8x1xi1>
    %144 = vector.broadcast %143 : vector<8x1xi1> to vector<8x32xi1>
    %145 = arith.select %144, %140, %116 : vector<8x32xi1>, vector<8x32xf32>
    %146 = vector.shape_cast %142 : vector<8x1xi1> to vector<8x1xi1>
    %147 = vector.broadcast %146 : vector<8x1xi1> to vector<8x32xi1>
    %148 = arith.select %147, %138, %119 : vector<8x32xi1>, vector<8x32xf32>
    %c5_i32 = arith.constant 5 : i32
    %149 = arith.index_cast %c5_i32 : i32 to index
    %c0_24 = arith.constant 0 : index
    %c0_25 = arith.constant 0 : index
    %150 = vector.load %arg1[%149, %c0_24, %c0_25] : memref<12x8x128xf32, #tpu.memory_space<vmem>>, vector<1x8x128xf32>
    %151 = vector.shape_cast %150 : vector<1x8x128xf32> to vector<8x128xf32>
    %cst_26 = arith.constant dense<0.000000e+00> : vector<8x128xf32>
    %152 = tpu.matmul %145, %0, %cst_26 {dimension_numbers = #tpu.dot_dimension_numbers<[1], [0], [0], [1], [0, 0, 1, 1], [], []>} : vector<8x32xf32>, vector<32x128xf32>, vector<8x128xf32> -> vector<8x128xf32>
    %153 = arith.addf %151, %152 : vector<8x128xf32>
    %154 = vector.extract_strided_slice %153 {offsets = [0, 0], sizes = [8, 96], strides = [1, 1]} : vector<8x128xf32> to vector<8x96xf32>
    %155 = arith.negf %154 : vector<8x96xf32>
    %156 = math.exp %155 : vector<8x96xf32>
    %cst_27 = arith.constant 1.000000e+00 : f32
    %157 = vector.broadcast %cst_27 : f32 to vector<8x96xf32>
    %158 = arith.addf %157, %156 : vector<8x96xf32>
    %159 = arith.divf %157, %158 : vector<8x96xf32>
    %160 = vector.extract_strided_slice %153 {offsets = [0, 96], sizes = [8, 32], strides = [1, 1]} : vector<8x128xf32> to vector<8x32xf32>
    %161 = math.tanh %160 : vector<8x32xf32>
    %162 = vector.extract_strided_slice %159 {offsets = [0, 0], sizes = [8, 32], strides = [1, 1]} : vector<8x96xf32> to vector<8x32xf32>
    %163 = vector.extract_strided_slice %159 {offsets = [0, 32], sizes = [8, 32], strides = [1, 1]} : vector<8x96xf32> to vector<8x32xf32>
    %164 = vector.extract_strided_slice %159 {offsets = [0, 64], sizes = [8, 32], strides = [1, 1]} : vector<8x96xf32> to vector<8x32xf32>
    %165 = arith.mulf %163, %148 : vector<8x32xf32>
    %166 = arith.mulf %162, %161 : vector<8x32xf32>
    %167 = arith.addf %165, %166 : vector<8x32xf32>
    %168 = math.tanh %167 : vector<8x32xf32>
    %169 = arith.mulf %164, %168 : vector<8x32xf32>
    %170 = vector.broadcast %c5_i32 : i32 to vector<8x1xi32>
    %171 = arith.cmpi slt, %170, %1 : vector<8x1xi32>
    %172 = vector.shape_cast %171 : vector<8x1xi1> to vector<8x1xi1>
    %173 = vector.broadcast %172 : vector<8x1xi1> to vector<8x32xi1>
    %174 = arith.select %173, %169, %145 : vector<8x32xi1>, vector<8x32xf32>
    %175 = vector.shape_cast %171 : vector<8x1xi1> to vector<8x1xi1>
    %176 = vector.broadcast %175 : vector<8x1xi1> to vector<8x32xi1>
    %177 = arith.select %176, %167, %148 : vector<8x32xi1>, vector<8x32xf32>
    %c6_i32 = arith.constant 6 : i32
    %178 = arith.index_cast %c6_i32 : i32 to index
    %c0_28 = arith.constant 0 : index
    %c0_29 = arith.constant 0 : index
    %179 = vector.load %arg1[%178, %c0_28, %c0_29] : memref<12x8x128xf32, #tpu.memory_space<vmem>>, vector<1x8x128xf32>
    %180 = vector.shape_cast %179 : vector<1x8x128xf32> to vector<8x128xf32>
    %cst_30 = arith.constant dense<0.000000e+00> : vector<8x128xf32>
    %181 = tpu.matmul %174, %0, %cst_30 {dimension_numbers = #tpu.dot_dimension_numbers<[1], [0], [0], [1], [0, 0, 1, 1], [], []>} : vector<8x32xf32>, vector<32x128xf32>, vector<8x128xf32> -> vector<8x128xf32>
    %182 = arith.addf %180, %181 : vector<8x128xf32>
    %183 = vector.extract_strided_slice %182 {offsets = [0, 0], sizes = [8, 96], strides = [1, 1]} : vector<8x128xf32> to vector<8x96xf32>
    %184 = arith.negf %183 : vector<8x96xf32>
    %185 = math.exp %184 : vector<8x96xf32>
    %cst_31 = arith.constant 1.000000e+00 : f32
    %186 = vector.broadcast %cst_31 : f32 to vector<8x96xf32>
    %187 = arith.addf %186, %185 : vector<8x96xf32>
    %188 = arith.divf %186, %187 : vector<8x96xf32>
    %189 = vector.extract_strided_slice %182 {offsets = [0, 96], sizes = [8, 32], strides = [1, 1]} : vector<8x128xf32> to vector<8x32xf32>
    %190 = math.tanh %189 : vector<8x32xf32>
    %191 = vector.extract_strided_slice %188 {offsets = [0, 0], sizes = [8, 32], strides = [1, 1]} : vector<8x96xf32> to vector<8x32xf32>
    %192 = vector.extract_strided_slice %188 {offsets = [0, 32], sizes = [8, 32], strides = [1, 1]} : vector<8x96xf32> to vector<8x32xf32>
    %193 = vector.extract_strided_slice %188 {offsets = [0, 64], sizes = [8, 32], strides = [1, 1]} : vector<8x96xf32> to vector<8x32xf32>
    %194 = arith.mulf %192, %177 : vector<8x32xf32>
    %195 = arith.mulf %191, %190 : vector<8x32xf32>
    %196 = arith.addf %194, %195 : vector<8x32xf32>
    %197 = math.tanh %196 : vector<8x32xf32>
    %198 = arith.mulf %193, %197 : vector<8x32xf32>
    %199 = vector.broadcast %c6_i32 : i32 to vector<8x1xi32>
    %200 = arith.cmpi slt, %199, %1 : vector<8x1xi32>
    %201 = vector.shape_cast %200 : vector<8x1xi1> to vector<8x1xi1>
    %202 = vector.broadcast %201 : vector<8x1xi1> to vector<8x32xi1>
    %203 = arith.select %202, %198, %174 : vector<8x32xi1>, vector<8x32xf32>
    %204 = vector.shape_cast %200 : vector<8x1xi1> to vector<8x1xi1>
    %205 = vector.broadcast %204 : vector<8x1xi1> to vector<8x32xi1>
    %206 = arith.select %205, %196, %177 : vector<8x32xi1>, vector<8x32xf32>
    %c7_i32 = arith.constant 7 : i32
    %207 = arith.index_cast %c7_i32 : i32 to index
    %c0_32 = arith.constant 0 : index
    %c0_33 = arith.constant 0 : index
    %208 = vector.load %arg1[%207, %c0_32, %c0_33] : memref<12x8x128xf32, #tpu.memory_space<vmem>>, vector<1x8x128xf32>
    %209 = vector.shape_cast %208 : vector<1x8x128xf32> to vector<8x128xf32>
    %cst_34 = arith.constant dense<0.000000e+00> : vector<8x128xf32>
    %210 = tpu.matmul %203, %0, %cst_34 {dimension_numbers = #tpu.dot_dimension_numbers<[1], [0], [0], [1], [0, 0, 1, 1], [], []>} : vector<8x32xf32>, vector<32x128xf32>, vector<8x128xf32> -> vector<8x128xf32>
    %211 = arith.addf %209, %210 : vector<8x128xf32>
    %212 = vector.extract_strided_slice %211 {offsets = [0, 0], sizes = [8, 96], strides = [1, 1]} : vector<8x128xf32> to vector<8x96xf32>
    %213 = arith.negf %212 : vector<8x96xf32>
    %214 = math.exp %213 : vector<8x96xf32>
    %cst_35 = arith.constant 1.000000e+00 : f32
    %215 = vector.broadcast %cst_35 : f32 to vector<8x96xf32>
    %216 = arith.addf %215, %214 : vector<8x96xf32>
    %217 = arith.divf %215, %216 : vector<8x96xf32>
    %218 = vector.extract_strided_slice %211 {offsets = [0, 96], sizes = [8, 32], strides = [1, 1]} : vector<8x128xf32> to vector<8x32xf32>
    %219 = math.tanh %218 : vector<8x32xf32>
    %220 = vector.extract_strided_slice %217 {offsets = [0, 0], sizes = [8, 32], strides = [1, 1]} : vector<8x96xf32> to vector<8x32xf32>
    %221 = vector.extract_strided_slice %217 {offsets = [0, 32], sizes = [8, 32], strides = [1, 1]} : vector<8x96xf32> to vector<8x32xf32>
    %222 = vector.extract_strided_slice %217 {offsets = [0, 64], sizes = [8, 32], strides = [1, 1]} : vector<8x96xf32> to vector<8x32xf32>
    %223 = arith.mulf %221, %206 : vector<8x32xf32>
    %224 = arith.mulf %220, %219 : vector<8x32xf32>
    %225 = arith.addf %223, %224 : vector<8x32xf32>
    %226 = math.tanh %225 : vector<8x32xf32>
    %227 = arith.mulf %222, %226 : vector<8x32xf32>
    %228 = vector.broadcast %c7_i32 : i32 to vector<8x1xi32>
    %229 = arith.cmpi slt, %228, %1 : vector<8x1xi32>
    %230 = vector.shape_cast %229 : vector<8x1xi1> to vector<8x1xi1>
    %231 = vector.broadcast %230 : vector<8x1xi1> to vector<8x32xi1>
    %232 = arith.select %231, %227, %203 : vector<8x32xi1>, vector<8x32xf32>
    %233 = vector.shape_cast %229 : vector<8x1xi1> to vector<8x1xi1>
    %234 = vector.broadcast %233 : vector<8x1xi1> to vector<8x32xi1>
    %235 = arith.select %234, %225, %206 : vector<8x32xi1>, vector<8x32xf32>
    %c8_i32 = arith.constant 8 : i32
    %236 = arith.index_cast %c8_i32 : i32 to index
    %c0_36 = arith.constant 0 : index
    %c0_37 = arith.constant 0 : index
    %237 = vector.load %arg1[%236, %c0_36, %c0_37] : memref<12x8x128xf32, #tpu.memory_space<vmem>>, vector<1x8x128xf32>
    %238 = vector.shape_cast %237 : vector<1x8x128xf32> to vector<8x128xf32>
    %cst_38 = arith.constant dense<0.000000e+00> : vector<8x128xf32>
    %239 = tpu.matmul %232, %0, %cst_38 {dimension_numbers = #tpu.dot_dimension_numbers<[1], [0], [0], [1], [0, 0, 1, 1], [], []>} : vector<8x32xf32>, vector<32x128xf32>, vector<8x128xf32> -> vector<8x128xf32>
    %240 = arith.addf %238, %239 : vector<8x128xf32>
    %241 = vector.extract_strided_slice %240 {offsets = [0, 0], sizes = [8, 96], strides = [1, 1]} : vector<8x128xf32> to vector<8x96xf32>
    %242 = arith.negf %241 : vector<8x96xf32>
    %243 = math.exp %242 : vector<8x96xf32>
    %cst_39 = arith.constant 1.000000e+00 : f32
    %244 = vector.broadcast %cst_39 : f32 to vector<8x96xf32>
    %245 = arith.addf %244, %243 : vector<8x96xf32>
    %246 = arith.divf %244, %245 : vector<8x96xf32>
    %247 = vector.extract_strided_slice %240 {offsets = [0, 96], sizes = [8, 32], strides = [1, 1]} : vector<8x128xf32> to vector<8x32xf32>
    %248 = math.tanh %247 : vector<8x32xf32>
    %249 = vector.extract_strided_slice %246 {offsets = [0, 0], sizes = [8, 32], strides = [1, 1]} : vector<8x96xf32> to vector<8x32xf32>
    %250 = vector.extract_strided_slice %246 {offsets = [0, 32], sizes = [8, 32], strides = [1, 1]} : vector<8x96xf32> to vector<8x32xf32>
    %251 = vector.extract_strided_slice %246 {offsets = [0, 64], sizes = [8, 32], strides = [1, 1]} : vector<8x96xf32> to vector<8x32xf32>
    %252 = arith.mulf %250, %235 : vector<8x32xf32>
    %253 = arith.mulf %249, %248 : vector<8x32xf32>
    %254 = arith.addf %252, %253 : vector<8x32xf32>
    %255 = math.tanh %254 : vector<8x32xf32>
    %256 = arith.mulf %251, %255 : vector<8x32xf32>
    %257 = vector.broadcast %c8_i32 : i32 to vector<8x1xi32>
    %258 = arith.cmpi slt, %257, %1 : vector<8x1xi32>
    %259 = vector.shape_cast %258 : vector<8x1xi1> to vector<8x1xi1>
    %260 = vector.broadcast %259 : vector<8x1xi1> to vector<8x32xi1>
    %261 = arith.select %260, %256, %232 : vector<8x32xi1>, vector<8x32xf32>
    %262 = vector.shape_cast %258 : vector<8x1xi1> to vector<8x1xi1>
    %263 = vector.broadcast %262 : vector<8x1xi1> to vector<8x32xi1>
    %264 = arith.select %263, %254, %235 : vector<8x32xi1>, vector<8x32xf32>
    %c9_i32 = arith.constant 9 : i32
    %265 = arith.index_cast %c9_i32 : i32 to index
    %c0_40 = arith.constant 0 : index
    %c0_41 = arith.constant 0 : index
    %266 = vector.load %arg1[%265, %c0_40, %c0_41] : memref<12x8x128xf32, #tpu.memory_space<vmem>>, vector<1x8x128xf32>
    %267 = vector.shape_cast %266 : vector<1x8x128xf32> to vector<8x128xf32>
    %cst_42 = arith.constant dense<0.000000e+00> : vector<8x128xf32>
    %268 = tpu.matmul %261, %0, %cst_42 {dimension_numbers = #tpu.dot_dimension_numbers<[1], [0], [0], [1], [0, 0, 1, 1], [], []>} : vector<8x32xf32>, vector<32x128xf32>, vector<8x128xf32> -> vector<8x128xf32>
    %269 = arith.addf %267, %268 : vector<8x128xf32>
    %270 = vector.extract_strided_slice %269 {offsets = [0, 0], sizes = [8, 96], strides = [1, 1]} : vector<8x128xf32> to vector<8x96xf32>
    %271 = arith.negf %270 : vector<8x96xf32>
    %272 = math.exp %271 : vector<8x96xf32>
    %cst_43 = arith.constant 1.000000e+00 : f32
    %273 = vector.broadcast %cst_43 : f32 to vector<8x96xf32>
    %274 = arith.addf %273, %272 : vector<8x96xf32>
    %275 = arith.divf %273, %274 : vector<8x96xf32>
    %276 = vector.extract_strided_slice %269 {offsets = [0, 96], sizes = [8, 32], strides = [1, 1]} : vector<8x128xf32> to vector<8x32xf32>
    %277 = math.tanh %276 : vector<8x32xf32>
    %278 = vector.extract_strided_slice %275 {offsets = [0, 0], sizes = [8, 32], strides = [1, 1]} : vector<8x96xf32> to vector<8x32xf32>
    %279 = vector.extract_strided_slice %275 {offsets = [0, 32], sizes = [8, 32], strides = [1, 1]} : vector<8x96xf32> to vector<8x32xf32>
    %280 = vector.extract_strided_slice %275 {offsets = [0, 64], sizes = [8, 32], strides = [1, 1]} : vector<8x96xf32> to vector<8x32xf32>
    %281 = arith.mulf %279, %264 : vector<8x32xf32>
    %282 = arith.mulf %278, %277 : vector<8x32xf32>
    %283 = arith.addf %281, %282 : vector<8x32xf32>
    %284 = math.tanh %283 : vector<8x32xf32>
    %285 = arith.mulf %280, %284 : vector<8x32xf32>
    %286 = vector.broadcast %c9_i32 : i32 to vector<8x1xi32>
    %287 = arith.cmpi slt, %286, %1 : vector<8x1xi32>
    %288 = vector.shape_cast %287 : vector<8x1xi1> to vector<8x1xi1>
    %289 = vector.broadcast %288 : vector<8x1xi1> to vector<8x32xi1>
    %290 = arith.select %289, %285, %261 : vector<8x32xi1>, vector<8x32xf32>
    %291 = vector.shape_cast %287 : vector<8x1xi1> to vector<8x1xi1>
    %292 = vector.broadcast %291 : vector<8x1xi1> to vector<8x32xi1>
    %293 = arith.select %292, %283, %264 : vector<8x32xi1>, vector<8x32xf32>
    %c10_i32 = arith.constant 10 : i32
    %294 = arith.index_cast %c10_i32 : i32 to index
    %c0_44 = arith.constant 0 : index
    %c0_45 = arith.constant 0 : index
    %295 = vector.load %arg1[%294, %c0_44, %c0_45] : memref<12x8x128xf32, #tpu.memory_space<vmem>>, vector<1x8x128xf32>
    %296 = vector.shape_cast %295 : vector<1x8x128xf32> to vector<8x128xf32>
    %cst_46 = arith.constant dense<0.000000e+00> : vector<8x128xf32>
    %297 = tpu.matmul %290, %0, %cst_46 {dimension_numbers = #tpu.dot_dimension_numbers<[1], [0], [0], [1], [0, 0, 1, 1], [], []>} : vector<8x32xf32>, vector<32x128xf32>, vector<8x128xf32> -> vector<8x128xf32>
    %298 = arith.addf %296, %297 : vector<8x128xf32>
    %299 = vector.extract_strided_slice %298 {offsets = [0, 0], sizes = [8, 96], strides = [1, 1]} : vector<8x128xf32> to vector<8x96xf32>
    %300 = arith.negf %299 : vector<8x96xf32>
    %301 = math.exp %300 : vector<8x96xf32>
    %cst_47 = arith.constant 1.000000e+00 : f32
    %302 = vector.broadcast %cst_47 : f32 to vector<8x96xf32>
    %303 = arith.addf %302, %301 : vector<8x96xf32>
    %304 = arith.divf %302, %303 : vector<8x96xf32>
    %305 = vector.extract_strided_slice %298 {offsets = [0, 96], sizes = [8, 32], strides = [1, 1]} : vector<8x128xf32> to vector<8x32xf32>
    %306 = math.tanh %305 : vector<8x32xf32>
    %307 = vector.extract_strided_slice %304 {offsets = [0, 0], sizes = [8, 32], strides = [1, 1]} : vector<8x96xf32> to vector<8x32xf32>
    %308 = vector.extract_strided_slice %304 {offsets = [0, 32], sizes = [8, 32], strides = [1, 1]} : vector<8x96xf32> to vector<8x32xf32>
    %309 = vector.extract_strided_slice %304 {offsets = [0, 64], sizes = [8, 32], strides = [1, 1]} : vector<8x96xf32> to vector<8x32xf32>
    %310 = arith.mulf %308, %293 : vector<8x32xf32>
    %311 = arith.mulf %307, %306 : vector<8x32xf32>
    %312 = arith.addf %310, %311 : vector<8x32xf32>
    %313 = math.tanh %312 : vector<8x32xf32>
    %314 = arith.mulf %309, %313 : vector<8x32xf32>
    %315 = vector.broadcast %c10_i32 : i32 to vector<8x1xi32>
    %316 = arith.cmpi slt, %315, %1 : vector<8x1xi32>
    %317 = vector.shape_cast %316 : vector<8x1xi1> to vector<8x1xi1>
    %318 = vector.broadcast %317 : vector<8x1xi1> to vector<8x32xi1>
    %319 = arith.select %318, %314, %290 : vector<8x32xi1>, vector<8x32xf32>
    %320 = vector.shape_cast %316 : vector<8x1xi1> to vector<8x1xi1>
    %321 = vector.broadcast %320 : vector<8x1xi1> to vector<8x32xi1>
    %322 = arith.select %321, %312, %293 : vector<8x32xi1>, vector<8x32xf32>
    %c11_i32 = arith.constant 11 : i32
    %323 = arith.index_cast %c11_i32 : i32 to index
    %c0_48 = arith.constant 0 : index
    %c0_49 = arith.constant 0 : index
    %324 = vector.load %arg1[%323, %c0_48, %c0_49] : memref<12x8x128xf32, #tpu.memory_space<vmem>>, vector<1x8x128xf32>
    %325 = vector.shape_cast %324 : vector<1x8x128xf32> to vector<8x128xf32>
    %cst_50 = arith.constant dense<0.000000e+00> : vector<8x128xf32>
    %326 = tpu.matmul %319, %0, %cst_50 {dimension_numbers = #tpu.dot_dimension_numbers<[1], [0], [0], [1], [0, 0, 1, 1], [], []>} : vector<8x32xf32>, vector<32x128xf32>, vector<8x128xf32> -> vector<8x128xf32>
    %327 = arith.addf %325, %326 : vector<8x128xf32>
    %328 = vector.extract_strided_slice %327 {offsets = [0, 0], sizes = [8, 96], strides = [1, 1]} : vector<8x128xf32> to vector<8x96xf32>
    %329 = arith.negf %328 : vector<8x96xf32>
    %330 = math.exp %329 : vector<8x96xf32>
    %cst_51 = arith.constant 1.000000e+00 : f32
    %331 = vector.broadcast %cst_51 : f32 to vector<8x96xf32>
    %332 = arith.addf %331, %330 : vector<8x96xf32>
    %333 = arith.divf %331, %332 : vector<8x96xf32>
    %334 = vector.extract_strided_slice %327 {offsets = [0, 96], sizes = [8, 32], strides = [1, 1]} : vector<8x128xf32> to vector<8x32xf32>
    %335 = math.tanh %334 : vector<8x32xf32>
    %336 = vector.extract_strided_slice %333 {offsets = [0, 0], sizes = [8, 32], strides = [1, 1]} : vector<8x96xf32> to vector<8x32xf32>
    %337 = vector.extract_strided_slice %333 {offsets = [0, 32], sizes = [8, 32], strides = [1, 1]} : vector<8x96xf32> to vector<8x32xf32>
    %338 = vector.extract_strided_slice %333 {offsets = [0, 64], sizes = [8, 32], strides = [1, 1]} : vector<8x96xf32> to vector<8x32xf32>
    %339 = arith.mulf %337, %322 : vector<8x32xf32>
    %340 = arith.mulf %336, %335 : vector<8x32xf32>
    %341 = arith.addf %339, %340 : vector<8x32xf32>
    %342 = math.tanh %341 : vector<8x32xf32>
    %343 = arith.mulf %338, %342 : vector<8x32xf32>
    %344 = vector.broadcast %c11_i32 : i32 to vector<8x1xi32>
    %345 = arith.cmpi slt, %344, %1 : vector<8x1xi32>
    %346 = vector.shape_cast %345 : vector<8x1xi1> to vector<8x1xi1>
    %347 = vector.broadcast %346 : vector<8x1xi1> to vector<8x32xi1>
    %348 = arith.select %347, %343, %319 : vector<8x32xi1>, vector<8x32xf32>
    %349 = vector.shape_cast %345 : vector<8x1xi1> to vector<8x1xi1>
    %350 = vector.broadcast %349 : vector<8x1xi1> to vector<8x32xi1>
    %351 = arith.select %350, %341, %322 : vector<8x32xi1>, vector<8x32xf32>
    %c12_i32 = arith.constant 12 : i32
    %c0_52 = arith.constant 0 : index
    %c0_53 = arith.constant 0 : index
    %352 = vector.load %arg4[%c0_52, %c0_53] : memref<1x32xf32, #tpu.memory_space<vmem>>, vector<1x32xf32>
    %353 = vector.broadcast %352 : vector<1x32xf32> to vector<8x32xf32>
    %354 = arith.mulf %348, %353 : vector<8x32xf32>
    %cst_54 = arith.constant dense<0.000000e+00> : vector<8xf32>
    %355 = vector.multi_reduction <add>, %354, %cst_54 [1] : vector<8x32xf32> to vector<8xf32>
    %356 = vector.shape_cast %355 : vector<8xf32> to vector<8x1xf32>
    %c0_55 = arith.constant 0 : index
    %c0_56 = arith.constant 0 : index
    %357 = vector.load %arg5[%c0_55, %c0_56] : memref<1x1xf32, #tpu.memory_space<vmem>>, vector<1x1xf32>
    %358 = vector.broadcast %357 : vector<1x1xf32> to vector<8x1xf32>
    %359 = arith.addf %356, %358 : vector<8x1xf32>
    %c0_57 = arith.constant 0 : index
    %c0_58 = arith.constant 0 : index
    %360 = vector.load %arg6[%c0_57, %c0_58] : memref<8x1xf32, #tpu.memory_space<vmem>>, vector<8x1xf32>
    tpu.vector_store %arg6[%c0_57, %c0_58], %359 {strides = array<i32>} : memref<8x1xf32, #tpu.memory_space<vmem>>, vector<8x1xf32>,
    return
  }
  func.func @transform_0(%arg0: i32) -> (i32, i32, i32) {
    %c0_i32 = arith.constant 0 : i32
    %c0_i32_0 = arith.constant 0 : i32
    %c0_i32_1 = arith.constant 0 : i32
    return %c0_i32, %arg0, %c0_i32_0 : i32, i32, i32
  }
  func.func @transform_1(%arg0: i32) -> (i32, i32) {
    %c0_i32 = arith.constant 0 : i32
    %c0_i32_0 = arith.constant 0 : i32
    return %arg0, %c0_i32 : i32, i32
  }
  func.func @transform_2(%arg0: i32) -> (i32, i32) {
    %c0_i32 = arith.constant 0 : i32
    %c0_i32_0 = arith.constant 0 : i32
    %c0_i32_1 = arith.constant 0 : i32
    return %c0_i32, %c0_i32_0 : i32, i32
  }
  func.func @transform_3(%arg0: i32) -> (i32, i32) {
    %c0_i32 = arith.constant 0 : i32
    %c0_i32_0 = arith.constant 0 : i32
    %c0_i32_1 = arith.constant 0 : i32
    return %c0_i32, %c0_i32_0 : i32, i32
  }
  func.func @transform_4(%arg0: i32) -> (i32, i32) {
    %c0_i32 = arith.constant 0 : i32
    %c0_i32_0 = arith.constant 0 : i32
    %c0_i32_1 = arith.constant 0 : i32
    return %c0_i32, %c0_i32_0 : i32, i32
  }
  func.func @transform_5(%arg0: i32) -> (i32, i32) {
    %c0_i32 = arith.constant 0 : i32
    %c0_i32_0 = arith.constant 0 : i32
    return %arg0, %c0_i32 : i32, i32
  }
}

</mosaic_0001>

<bundles_post_ra>
// kernel: rnn_forward.1
= control target key start
LH: loop header
LB: loop body
LE: loop exit
PB: predicated region body
PF: predicated region fallthrough
CT: control target
= control target key end

     0   :  { %s2503_s0 = inlined_call_operand.vmem [shape: f32[12,16,128], index: 0, kind: input, shape index: {}]   ;;  %s2504_s1 = inlined_call_operand.vmem [shape: s32[16,1], index: 1, kind: input, shape index: {}]   ;;  %s2505_s2 = inlined_call_operand.vmem [shape: f32[32,128], index: 2, kind: input, shape index: {}]   ;;  %s2506_s3 = inlined_call_operand.vmem [shape: f32[1,32], index: 3, kind: input, shape index: {}]   ;;  %s2507_s4 = inlined_call_operand.<no memory space> [shape: f32[1,1], index: 4, kind: input, shape index: {}]   ;;  %s2508_s5 = inlined_call_operand.vmem [shape: f32[16,1], index: 5, kind: output, shape index: {}]  }
   0x1   :  { %v10_v0 = vstv %s2507_s4 }
   0x2   :  { %11 = vst [vmem:[#allocation2] sm:$0x1] %v10_v0 }
   0x3   :  { %s2170_s20 = smov 0   ;;  %s2172_s21 = smov 0  }
   0x4   :  { %s2174_s22 = smov 0  }
   0x5 LB: > { %s1741_s4 = sadd.s32 4294967295, %s2130_s22   ;;  %s2187_s23 = sadd.s32 1, %s2130_s22   ;;  %s2130_s22 = sphi %s2174_s22, %s2511_s22   ;;  %s2126_s21 = sphi %s2172_s21, %s2510_s21   ;;  %s2122_s20 = sphi %s2170_s20, %s2509_s20  }
   0x6   : > { %s21_s24 = ssub.s32 %s2130_s22, %s2187_s23  ;;  %s24_s25 = sadd.s32 1, %s2126_s21 }
   0x7   : > { %p22_p0 = scmp.eq.s32.totalorder %s21_s24, 0  ;;  %p31_p1 = scmp.ne.s32.totalorder %s2126_s21, %s2122_s20 }
   0x8   : > { %p32_p2 = scmp.eq.s32.totalorder %s2130_s22, 0  ;;  %p1744_p4 = scmp.ge.s32.totalorder %s2130_s22, 2 }
   0x9   : > { %s2196_s26 = scalar_select %p22_p0, %s2126_s21, %s24_s25  }
   0xa   : > { %p33_p3 = por %p32_p2, %p31_p1  ;;  %181 = sbr.rel (%p1744_p4) target bundleno = 25 (0x19), region = 28 }
   0xf   : > { %184 = sbr.rel (!%p33_p3) target bundleno = 25 (0x19), region = 32  ;;  %s186_s27 = sand.u32 (%p33_p3), 1, %s2126_s21  }
  0x10   : > { %s1745_s28 = sshll.u32 (%p33_p3), %s2130_s22, 3  ;;  %s1979_s29 = smul.u32 (%p33_p3), 96, %s186_s27 }
  0x11   : > { %s190_s7 = scalar_lea.vmem (%p33_p3), %s2503_s0, %s1745_s28 }
  0x12   : > { %v241_v1 = vld [vmem:[%s190_s7] sm:$0xff] (%p33_p3)  ;;  %v243_v2 = vld [vmem:[%s190_s7 + $0x10] sm:$0xff] (%p33_p3)  ;;  %s188_s8 = scalar_lea.vmem (%p33_p3), [#allocation3], %s1979_s29 }
  0x13   : > { %v245_v3 = vld [vmem:[%s190_s7 + $0x20] sm:$0xff] (%p33_p3)  ;;  %v247_v4 = vld [vmem:[%s190_s7 + $0x30] sm:$0xff] (%p33_p3)  ;;  %242 = vst [vmem:[%s188_s8] sm:$0xff] (%p33_p3), %v241_v1  ;;  %244 = vst [vmem:[%s188_s8 + $0x8] sm:$0xff] (%p33_p3), %v243_v2 }
  0x14   : > { %v249_v5 = vld [vmem:[%s190_s7 + $0x40] sm:$0xff]  ;;  %v251_v6 = vld [vmem:[%s190_s7 + $0x50] sm:$0xff]  ;;  %246 = vst [vmem:[%s188_s8 + $0x10] sm:$0xff] %v245_v3  ;;  %248 = vst [vmem:[%s188_s8 + $0x18] sm:$0xff] %v247_v4 }
  0x15   : > { %250 = vst [vmem:[%s188_s8 + $0x20] sm:$0xff] %v249_v5  ;;  %252 = vst [vmem:[%s188_s8 + $0x28] sm:$0xff] %v251_v6  ;;  %v253_v7 = vld [vmem:[%s190_s7 + $0x60] sm:$0xff]  ;;  %v255_v8 = vld [vmem:[%s190_s7 + $0x70] sm:$0xff] }
  0x16   : > { %v257_v9 = vld [vmem:[%s190_s7 + $0x80] sm:$0xff]  ;;  %254 = vst [vmem:[%s188_s8 + $0x30] sm:$0xff] %v253_v7  ;;  %256 = vst [vmem:[%s188_s8 + $0x38] sm:$0xff] %v255_v8  ;;  %v259_v10 = vld [vmem:[%s190_s7 + $0x90] sm:$0xff] }
  0x17   : > { %258 = vst [vmem:[%s188_s8 + $0x40] sm:$0xff] %v257_v9  ;;  %v261_v11 = vld [vmem:[%s190_s7 + $0xa0] sm:$0xff]  ;;  %v263_v12 = vld [vmem:[%s190_s7 + $0xb0] sm:$0xff]  ;;  %260 = vst [vmem:[%s188_s8 + $0x48] sm:$0xff] %v259_v10 }
  0x18   : > { %262 = vst [vmem:[%s188_s8 + $0x50] sm:$0xff] %v261_v11  ;;  %264 = vst [vmem:[%s188_s8 + $0x58] sm:$0xff] %v263_v12 }
  0x19 PF: > { %p1746_p5 = scmp.ge.s32.totalorder %s2130_s22, 1  ;;  %p276_p6 = scmp.lt.s32.totalorder %s2130_s22, 3 }
  0x1b   : > { %p277_p7 = pnand %p1746_p5, %p276_p6 }
  0x1c   : > { %p313_p8 = scmp.lt.s32.totalorder (!%p277_p7), %s1741_s4, 1  ;;  %s283_s25 = sand.u32 (!%p277_p7), 1, %s2122_s20  }
  0x1d   : > { %280 = sbr.rel (%p277_p7) target bundleno = 8467 (0x2113), region = 74  ;;  %s2135_s28 = smov (!%p277_p7), 32  }
  0x1e   : > { %s1980_s27 = smul.u32 (!%p277_p7), 96, %s283_s25  ;;  %s2136_s20 = smov (!%p277_p7), 64  }
  0x20   : > { %s2278_s22 = scalar_lea.vmem (!%p277_p7), [#allocation3], %s1980_s27 }
  0x22   : > { %v2209_v13 = vld [vmem:[%s2505_s2 + $0x18] sm:$0xff]  ;;  %v2132_v14 = vmov 0.0   ;;  %v2215_v15 = vld [vmem:[%s2505_s2 + $0x10] sm:$0xff]  ;;  %vm2133_vm0 = vmmov 0   ;;  %v2225_v16 = vld [vmem:[%s2505_s2 + $0x8] sm:$0xff]  ;;  %v2134_v18 = vmov 0  }
  0x23   : > { %1847 = vmatprep.subr.mxu0 %v2132_v14  ;;  %1855 = vmatprep.mubr.msk.f32.mxu0 %vm2133_vm0, %v2132_v14  ;;  %v2234_v17 = vld [vmem:[%s2505_s2] sm:$0xff]  ;;  %s2513_s4 = smov (!%p313_p8, %s1741_s4), 1  ;;  %vm327_vm3 = vcmask 261120   ;;  %v1750_v41 = vld [vmem:[%s2278_s22 + $0x8] sm:$0xff]  ;;  %v1753_v63 = vld [vmem:[%s2278_s22 + $0x10] sm:$0xff] }
  0x24   : > { %1848 = vmatpush3.msra.mxu0 %v2209_v13  ;;  %1858 = vmatprep.subr.mxu1 %v2132_v14  ;;  %s1747_s17 = sshll.u32 %s2513_s4, 3  ;;  %v326_v21 = vld [vmem:[%s2278_s22] sm:$0xff] }
  0x25   : > { %1849 = vmatprep.subr.mxu0 %v2132_v14  ;;  %1859 = vmatpush3.msra.mxu1 %v2209_v13  ;;  %s316_s24 = scalar_lea.vmem %s2504_s1, %s1747_s17  ;;  %s320_s8 = scalar_lea.vmem %s2508_s5, %s1747_s17 }
  0x26   : > { %1850 = vmatpush3.msra.mxu0 %v2215_v15  ;;  %1860 = vmatprep.subr.mxu1 %v2132_v14  ;;  %v2273_v19 = vld [vmem:[%s316_s24] sm:$0xff] }
  0x27   : > { %1851 = vmatprep.subr.mxu0 %v2132_v14  ;;  %1861 = vmatpush3.msra.mxu1 %v2215_v15  ;;  %vm426_vm1 = vcmp.gt.s32.totalorder %v2273_v19, 0  ;;  %vm536_vm4 = vcmp.gt.s32.totalorder %v2273_v19, 1  ;;  %vm646_vm6 = vcmp.gt.s32.totalorder %v2273_v19, 2  ;;  %vm756_vm8 = vcmp.gt.s32.totalorder %v2273_v19, 3 }
  0x28   : > { %1852 = vmatpush3.msra.mxu0 %v2225_v16  ;;  %1862 = vmatprep.subr.mxu1 %v2132_v14  ;;  %v427_v20 = vsel %vm426_vm1, 1, %v2134_v18  ;;  %v537_v46 = vsel %vm536_vm4, 1, %v2134_v18  ;;  %v647_v4 = vsel %vm646_vm6, 1, %v2134_v18  ;;  %vm866_vm10 = vcmp.gt.s32.totalorder %v2273_v19, 4 }
  0x29   : > { %1853 = vmatprep.subr.mxu0 %v2132_v14  ;;  %1863 = vmatpush3.msra.mxu1 %v2225_v16  ;;  %vm976_vm12 = vcmp.gt.s32.totalorder %v2273_v19, 5  ;;  %vm1086_vm14 = vcmp.gt.s32.totalorder %v2273_v19, 6  ;;  %vm1196_vm1 = vcmp.gt.s32.totalorder %v2273_v19, 7  ;;  %vm1306_vm4 = vcmp.gt.s32.totalorder %v2273_v19, 8 }
  0x2a   : > { %1854 = vmatpush3.msra.mxu0 %v2234_v17  ;;  %1864 = vmatprep.subr.mxu1 %v2132_v14  ;;  %vm1416_vm6 = vcmp.gt.s32.totalorder %v2273_v19, 9 }
  0x2b   : > { %1856 = vmatmul.mubr.f32.vlgmr.msra.gmra.mxu0 %v2132_v14  ;;  %1865 = vmatpush3.msra.mxu1 %v2234_v17 }
  0x2c   : > { %1866 = vmatprep.mubr.msk.f32.mxu1 %vm2133_vm0, %v2132_v14  ;;  %1869 = vmatprep.subr.mxu0 %v2132_v14 }
  0x2d   : > { %1870 = vmatpush3.msra.mxu0 %v2209_v13  ;;  %1877 = vmatprep.mubr.msk.f32.mxu0 %vm2133_vm0, %v2132_v14 }
  0x2e   : > { %1871 = vmatprep.subr.mxu0 %v2132_v14  ;;  %1880 = vmatprep.subr.mxu1 %v2132_v14 }
  0x2f   : > { %1872 = vmatpush3.msra.mxu0 %v2215_v15  ;;  %2010 = vset.pattern.permute.xlu1 %v2134_v18 }
  0x30   : > { %1873 = vmatprep.subr.mxu0 %v2132_v14  ;;  %2011 = vset.pattern.permute.xlu0 %v2134_v18 }
  0x31   : > { %1874 = vmatpush3.msra.mxu0 %v2225_v16  ;;  %429 = vperm.xlu1 %2010, %v427_v20  }
  0x32   : > { %1875 = vmatprep.subr.mxu0 %v2132_v14 }
  0x33   : > { %1876 = vmatpush3.msra.mxu0 %v2234_v17 }
  0x34   : > { %1891 = vmatprep.subr.mxu0 %v2132_v14 }
  0xac   : > { %v430_v36 = vpop.permute.xlu1 %429 }
  0xad   : > { %vm431_vm2 = vcmp.eq.s32.totalorder %v430_v36, 1 }
  0xeb   : > { %v397_v22 = vpop.f32.mrf.mxu0 }
  0xec   : > { %v401_v23 = vadd.f32 %v397_v22, %v326_v21 }
  0xed   : > { %v1857_v24 = vpop.f32.mrf.mxu0 }
  0xee   : > { %2012 = vtanh.f32 %v401_v23  ;;  %v1749_v26 = vmul.f32 -1.442695, %v401_v23 }
  0xf0   : > { %2014 = vpow2.f32 %v1749_v26 }
  0xfb   : > { %v2013_v25 = vpop.eup %2012 }
  0xfc   : > { %411 = vrot.lane.b32.xlu0 %v2013_v25, %s2135_s28 }
  0xfd   : > { %v2015_v27 = vpop.eup %2014 }
  0xfe   : > { %v405_v28 = vadd.f32 1.0, %v2015_v27 }
 0x100   : > { %2016 = vrcp.f32 %v405_v28  ;;  %v1756_v28 = vld [vmem:[%s2278_s22 + $0x18] sm:$0xff] }
 0x10d   : > { %v2017_v29 = vpop.eup %2016 }
 0x10e   : > { %v409_v32 = vmul.f32 0.0, %v2017_v29 }
 0x16e   : > { %v412_v30 = vpop.permute.xlu0 %411 }
 0x16f   : > { %v414_v31 = vmul.f32 %v2017_v29, %v412_v30 }
 0x171   : > { %416 = vrot.lane.b32.xlu0 %v414_v31, %s2135_s28 }
 0x1e3   : > { %v417_v33 = vpop.permute.xlu0 %416 }
 0x1e4   : > { %v419_v34 = vadd.f32 %v417_v33, %v409_v32  ;;  %v757_v33 = vsel %vm756_vm8, 1, %v2134_v18 }
 0x1e6   : > { %2018 = vtanh.f32 %v419_v34  ;;  %v433_v53 = vsel %vm431_vm2, %v419_v34, 0.0 }
 0x1f3   : > { %v2019_v35 = vpop.eup %2018 }
 0x1f4   : > { %422 = vrot.lane.b32.xlu1 %v2019_v35, %s2135_s28 }
 0x266   : > { %v423_v37 = vpop.permute.xlu1 %422 }
 0x267   : > { %v425_v38 = vmul.f32 %v2017_v29, %v423_v37 }
 0x269   : > { %v432_v39 = vsel %vm431_vm2, %v425_v38, 0.0 }
 0x26a   : > { %437 = vrot.lane.b32.xlu0 %v432_v39, %s2136_s20 }
 0x2dc   : > { %v438_v40 = vpop.permute.xlu0 %437 }
 0x2dd   : > { %1867 = vmatmul.mubr.msk.f32.vlgmr.msra.gmra.mxu1 %vm327_vm3, %v438_v40 }
 0x2de   : > { %1881 = vmatpush3.msra.mxu1 %v2209_v13  ;;  %1888 = vmatprep.mubr.msk.f32.mxu1 %vm2133_vm0, %v2132_v14 }
 0x2df   : > { %1882 = vmatprep.subr.mxu1 %v2132_v14 }
 0x2e0   : > { %1883 = vmatpush3.msra.mxu1 %v2215_v15 }
 0x2e1   : > { %1884 = vmatprep.subr.mxu1 %v2132_v14 }
 0x2e2   : > { %1885 = vmatpush3.msra.mxu1 %v2225_v16 }
 0x2e3   : > { %1886 = vmatprep.subr.mxu1 %v2132_v14 }
 0x2e4   : > { %1887 = vmatpush3.msra.mxu1 %v2234_v17 }
 0x2e5   : > { %1902 = vmatprep.subr.mxu1 %v2132_v14 }
 0x39d   : > { %v507_v42 = vpop.f32.mrf.mxu1 }
 0x39e   : > { %v511_v43 = vadd.f32 %v1750_v41, %v507_v42 }
 0x39f   : > { %v1868_v44 = vpop.f32.mrf.mxu1 }
 0x3a0   : > { %2020 = vtanh.f32 %v511_v43  ;;  %v1752_v47 = vmul.f32 -1.442695, %v511_v43 }
 0x3a2   : > { %2022 = vpow2.f32 %v1752_v47 }
 0x3ad   : > { %v2021_v45 = vpop.eup %2020 }
 0x3ae   : > { %521 = vrot.lane.b32.xlu1 %v2021_v45, %s2135_s28 }
 0x3af   : > { %v2023_v48 = vpop.eup %2022 }
 0x3b0   : > { %v515_v49 = vadd.f32 1.0, %v2023_v48 }
 0x3b2   : > { %539 = vperm.xlu1 %2010, %v537_v46   ;;  %2024 = vrcp.f32 %v515_v49 }
 0x3bf   : > { %v2025_v50 = vpop.eup %2024 }
 0x3c0   : > { %v519_v54 = vmul.f32 %v2025_v50, %v433_v53 }
 0x420   : > { %v522_v51 = vpop.permute.xlu1 %521 }
 0x421   : > { %v524_v52 = vmul.f32 %v2025_v50, %v522_v51 }
 0x423   : > { %526 = vrot.lane.b32.xlu0 %v524_v52, %s2135_s28 }
 0x42d   : > { %v540_v58 = vpop.permute.xlu1 %539 }
 0x42e   : > { %vm541_vm5 = vcmp.eq.s32.totalorder %v540_v58, 1 }
 0x495   : > { %v527_v55 = vpop.permute.xlu0 %526 }
 0x496   : > { %v529_v56 = vadd.f32 %v527_v55, %v519_v54  ;;  %v867_v55 = vsel %vm866_vm10, 1, %v2134_v18 }
 0x498   : > { %2026 = vtanh.f32 %v529_v56  ;;  %v543_v11 = vsel %vm541_vm5, %v529_v56, %v433_v53 }
 0x4a5   : > { %v2027_v57 = vpop.eup %2026 }
 0x4a6   : > { %532 = vrot.lane.b32.xlu0 %v2027_v57, %s2135_s28 }
 0x518   : > { %v533_v59 = vpop.permute.xlu0 %532 }
 0x519   : > { %v535_v60 = vmul.f32 %v2025_v50, %v533_v59  ;;  %v1759_v50 = vld [vmem:[%s2278_s22 + $0x20] sm:$0xff] }
 0x51b   : > { %v542_v61 = vsel %vm541_vm5, %v535_v60, %v432_v39 }
 0x51c   : > { %547 = vrot.lane.b32.xlu1 %v542_v61, %s2136_s20 }
 0x58e   : > { %v548_v62 = vpop.permute.xlu1 %547 }
 0x58f   : > { %1878 = vmatmul.mubr.msk.f32.vlgmr.msra.gmra.mxu0 %vm327_vm3, %v548_v62 }
 0x590   : > { %1892 = vmatpush3.msra.mxu0 %v2209_v13  ;;  %1899 = vmatprep.mubr.msk.f32.mxu0 %vm2133_vm0, %v2132_v14 }
 0x591   : > { %1893 = vmatprep.subr.mxu0 %v2132_v14 }
 0x592   : > { %1894 = vmatpush3.msra.mxu0 %v2215_v15 }
 0x593   : > { %1895 = vmatprep.subr.mxu0 %v2132_v14 }
 0x594   : > { %1896 = vmatpush3.msra.mxu0 %v2225_v16 }
 0x595   : > { %1897 = vmatprep.subr.mxu0 %v2132_v14 }
 0x596   : > { %1898 = vmatpush3.msra.mxu0 %v2234_v17 }
 0x597   : > { %1913 = vmatprep.subr.mxu0 %v2132_v14 }
 0x64f   : > { %v617_v0 = vpop.f32.mrf.mxu0 }
 0x650   : > { %v621_v1 = vadd.f32 %v1753_v63, %v617_v0 }
 0x651   : > { %v1879_v2 = vpop.f32.mrf.mxu0 }
 0x652   : > { %2028 = vtanh.f32 %v621_v1  ;;  %v1755_v5 = vmul.f32 -1.442695, %v621_v1 }
 0x654   : > { %2030 = vpow2.f32 %v1755_v5 }
 0x65f   : > { %v2029_v3 = vpop.eup %2028 }
 0x660   : > { %631 = vrot.lane.b32.xlu0 %v2029_v3, %s2135_s28 }
 0x661   : > { %v2031_v6 = vpop.eup %2030 }
 0x662   : > { %v625_v7 = vadd.f32 1.0, %v2031_v6 }
 0x664   : > { %649 = vperm.xlu0 %2011, %v647_v4   ;;  %2032 = vrcp.f32 %v625_v7 }
 0x671   : > { %v2033_v8 = vpop.eup %2032 }
 0x672   : > { %v629_v12 = vmul.f32 %v2033_v8, %v543_v11 }
 0x6d2   : > { %v632_v9 = vpop.permute.xlu0 %631 }
 0x6d3   : > { %v634_v10 = vmul.f32 %v2033_v8, %v632_v9 }
 0x6d5   : > { %636 = vrot.lane.b32.xlu1 %v634_v10, %s2135_s28 }
 0x6df   : > { %v650_v23 = vpop.permute.xlu0 %649 }
 0x6e0   : > { %vm651_vm7 = vcmp.eq.s32.totalorder %v650_v23, 1 }
 0x747   : > { %v637_v20 = vpop.permute.xlu1 %636 }
 0x748   : > { %v639_v21 = vadd.f32 %v637_v20, %v629_v12  ;;  %v977_v20 = vsel %vm976_vm12, 1, %v2134_v18 }
 0x74a   : > { %2034 = vtanh.f32 %v639_v21  ;;  %v653_v40 = vsel %vm651_vm7, %v639_v21, %v543_v11 }
 0x757   : > { %v2035_v22 = vpop.eup %2034 }
 0x758   : > { %642 = vrot.lane.b32.xlu1 %v2035_v22, %s2135_s28 }
 0x7ca   : > { %v643_v24 = vpop.permute.xlu1 %642 }
 0x7cb   : > { %v645_v25 = vmul.f32 %v2033_v8, %v643_v24  ;;  %v1762_v8 = vld [vmem:[%s2278_s22 + $0x28] sm:$0xff] }
 0x7cd   : > { %v652_v26 = vsel %vm651_vm7, %v645_v25, %v542_v61  ;;  %vm1526_vm7 = vcmp.gt.s32.totalorder %v2273_v19, 10 }
 0x7ce   : > { %657 = vrot.lane.b32.xlu1 %v652_v26, %s2136_s20 }
 0x840   : > { %v658_v27 = vpop.permute.xlu1 %657 }
 0x841   : > { %1889 = vmatmul.mubr.msk.f32.vlgmr.msra.gmra.mxu1 %vm327_vm3, %v658_v27 }
 0x842   : > { %1903 = vmatpush3.msra.mxu1 %v2209_v13  ;;  %1910 = vmatprep.mubr.msk.f32.mxu1 %vm2133_vm0, %v2132_v14 }
 0x843   : > { %1904 = vmatprep.subr.mxu1 %v2132_v14 }
 0x844   : > { %1905 = vmatpush3.msra.mxu1 %v2215_v15 }
 0x845   : > { %1906 = vmatprep.subr.mxu1 %v2132_v14 }
 0x846   : > { %1907 = vmatpush3.msra.mxu1 %v2225_v16 }
 0x847   : > { %1908 = vmatprep.subr.mxu1 %v2132_v14 }
 0x848   : > { %1909 = vmatpush3.msra.mxu1 %v2234_v17 }
 0x849   : > { %1924 = vmatprep.subr.mxu1 %v2132_v14 }
 0x901   : > { %v727_v29 = vpop.f32.mrf.mxu1 }
 0x902   : > { %v731_v30 = vadd.f32 %v1756_v28, %v727_v29 }
 0x903   : > { %v1890_v31 = vpop.f32.mrf.mxu1 }
 0x904   : > { %2036 = vtanh.f32 %v731_v30  ;;  %v1758_v34 = vmul.f32 -1.442695, %v731_v30 }
 0x906   : > { %2038 = vpow2.f32 %v1758_v34 }
 0x911   : > { %v2037_v32 = vpop.eup %2036 }
 0x912   : > { %741 = vrot.lane.b32.xlu0 %v2037_v32, %s2135_s28 }
 0x913   : > { %v2039_v35 = vpop.eup %2038 }
 0x914   : > { %v735_v36 = vadd.f32 1.0, %v2039_v35 }
 0x916   : > { %759 = vperm.xlu0 %2011, %v757_v33   ;;  %2040 = vrcp.f32 %v735_v36 }
 0x923   : > { %v2041_v37 = vpop.eup %2040 }
 0x924   : > { %v739_v41 = vmul.f32 %v2041_v37, %v653_v40 }
 0x984   : > { %v742_v38 = vpop.permute.xlu0 %741 }
 0x985   : > { %v744_v39 = vmul.f32 %v2041_v37, %v742_v38 }
 0x987   : > { %746 = vrot.lane.b32.xlu1 %v744_v39, %s2135_s28 }
 0x991   : > { %v760_v45 = vpop.permute.xlu0 %759 }
 0x992   : > { %vm761_vm9 = vcmp.eq.s32.totalorder %v760_v45, 1 }
 0x9f9   : > { %v747_v42 = vpop.permute.xlu1 %746 }
 0x9fa   : > { %v749_v43 = vadd.f32 %v747_v42, %v739_v41  ;;  %v1087_v42 = vsel %vm1086_vm14, 1, %v2134_v18 }
 0x9fc   : > { %2042 = vtanh.f32 %v749_v43  ;;  %v763_v62 = vsel %vm761_vm9, %v749_v43, %v653_v40 }
 0xa09   : > { %v2043_v44 = vpop.eup %2042 }
 0xa0a   : > { %752 = vrot.lane.b32.xlu1 %v2043_v44, %s2135_s28 }
 0xa7c   : > { %v753_v46 = vpop.permute.xlu1 %752 }
 0xa7d   : > { %v755_v47 = vmul.f32 %v2041_v37, %v753_v46  ;;  %v1765_v37 = vld [vmem:[%s2278_s22 + $0x30] sm:$0xff] }
 0xa7f   : > { %v762_v48 = vsel %vm761_vm9, %v755_v47, %v652_v26  ;;  %vm1636_vm9 = vcmp.gt.s32.totalorder %v2273_v19, 11  ;;  %v1783_v19 = vld [vmem:[%s2506_s3] ss:$0 sm:$0xff] }
 0xa80   : > { %767 = vrot.lane.b32.xlu0 %v762_v48, %s2136_s20 }
 0xaf2   : > { %v768_v49 = vpop.permute.xlu0 %767 }
 0xaf3   : > { %1900 = vmatmul.mubr.msk.f32.vlgmr.msra.gmra.mxu0 %vm327_vm3, %v768_v49 }
 0xaf4   : > { %1914 = vmatpush3.msra.mxu0 %v2209_v13  ;;  %1921 = vmatprep.mubr.msk.f32.mxu0 %vm2133_vm0, %v2132_v14 }
 0xaf5   : > { %1915 = vmatprep.subr.mxu0 %v2132_v14 }
 0xaf6   : > { %1916 = vmatpush3.msra.mxu0 %v2215_v15 }
 0xaf7   : > { %1917 = vmatprep.subr.mxu0 %v2132_v14 }
 0xaf8   : > { %1918 = vmatpush3.msra.mxu0 %v2225_v16 }
 0xaf9   : > { %1919 = vmatprep.subr.mxu0 %v2132_v14 }
 0xafa   : > { %1920 = vmatpush3.msra.mxu0 %v2234_v17 }
 0xafb   : > { %1935 = vmatprep.subr.mxu0 %v2132_v14 }
 0xbb3   : > { %v837_v51 = vpop.f32.mrf.mxu0 }
 0xbb4   : > { %v841_v52 = vadd.f32 %v1759_v50, %v837_v51 }
 0xbb5   : > { %v1901_v53 = vpop.f32.mrf.mxu0 }
 0xbb6   : > { %2044 = vtanh.f32 %v841_v52  ;;  %v1761_v56 = vmul.f32 -1.442695, %v841_v52 }
 0xbb8   : > { %2046 = vpow2.f32 %v1761_v56 }
 0xbc3   : > { %v2045_v54 = vpop.eup %2044 }
 0xbc4   : > { %851 = vrot.lane.b32.xlu1 %v2045_v54, %s2135_s28 }
 0xbc5   : > { %v2047_v57 = vpop.eup %2046 }
 0xbc6   : > { %v845_v58 = vadd.f32 1.0, %v2047_v57 }
 0xbc8   : > { %869 = vperm.xlu1 %2010, %v867_v55   ;;  %2048 = vrcp.f32 %v845_v58 }
 0xbd5   : > { %v2049_v59 = vpop.eup %2048 }
 0xbd6   : > { %v849_v63 = vmul.f32 %v2049_v59, %v763_v62 }
 0xc36   : > { %v852_v60 = vpop.permute.xlu1 %851 }
 0xc37   : > { %v854_v61 = vmul.f32 %v2049_v59, %v852_v60 }
 0xc39   : > { %856 = vrot.lane.b32.xlu0 %v854_v61, %s2135_s28 }
 0xc43   : > { %v870_v3 = vpop.permute.xlu1 %869 }
 0xc44   : > { %vm871_vm11 = vcmp.eq.s32.totalorder %v870_v3, 1 }
 0xcab   : > { %v857_v0 = vpop.permute.xlu0 %856 }
 0xcac   : > { %v859_v1 = vadd.f32 %v857_v0, %v849_v63  ;;  %v1197_v0 = vsel %vm1196_vm1, 1, %v2134_v18 }
 0xcae   : > { %2050 = vtanh.f32 %v859_v1  ;;  %v873_v27 = vsel %vm871_vm11, %v859_v1, %v763_v62 }
 0xcbb   : > { %v2051_v2 = vpop.eup %2050 }
 0xcbc   : > { %862 = vrot.lane.b32.xlu0 %v2051_v2, %s2135_s28 }
 0xd2e   : > { %v863_v4 = vpop.permute.xlu0 %862 }
 0xd2f   : > { %v865_v5 = vmul.f32 %v2049_v59, %v863_v4  ;;  %v1768_v59 = vld [vmem:[%s2278_s22 + $0x38] sm:$0xff] }
 0xd31   : > { %v872_v6 = vsel %vm871_vm11, %v865_v5, %v762_v48  ;;  %vm1668_vm11 = vcmask 7168  }
 0xd32   : > { %877 = vrot.lane.b32.xlu1 %v872_v6, %s2136_s20 }
 0xda4   : > { %v878_v7 = vpop.permute.xlu1 %877 }
 0xda5   : > { %1911 = vmatmul.mubr.msk.f32.vlgmr.msra.gmra.mxu1 %vm327_vm3, %v878_v7 }
 0xda6   : > { %1925 = vmatpush3.msra.mxu1 %v2209_v13  ;;  %1932 = vmatprep.mubr.msk.f32.mxu1 %vm2133_vm0, %v2132_v14 }
 0xda7   : > { %1926 = vmatprep.subr.mxu1 %v2132_v14 }
 0xda8   : > { %1927 = vmatpush3.msra.mxu1 %v2215_v15 }
 0xda9   : > { %1928 = vmatprep.subr.mxu1 %v2132_v14 }
 0xdaa   : > { %1929 = vmatpush3.msra.mxu1 %v2225_v16 }
 0xdab   : > { %1930 = vmatprep.subr.mxu1 %v2132_v14 }
 0xdac   : > { %1931 = vmatpush3.msra.mxu1 %v2234_v17 }
 0xdad   : > { %1946 = vmatprep.subr.mxu1 %v2132_v14 }
 0xe65   : > { %v947_v9 = vpop.f32.mrf.mxu1 }
 0xe66   : > { %v951_v10 = vadd.f32 %v1762_v8, %v947_v9 }
 0xe67   : > { %v1912_v11 = vpop.f32.mrf.mxu1 }
 0xe68   : > { %2052 = vtanh.f32 %v951_v10  ;;  %v1764_v21 = vmul.f32 -1.442695, %v951_v10 }
 0xe6a   : > { %2054 = vpow2.f32 %v1764_v21 }
 0xe75   : > { %v2053_v12 = vpop.eup %2052 }
 0xe76   : > { %961 = vrot.lane.b32.xlu0 %v2053_v12, %s2135_s28 }
 0xe77   : > { %v2055_v22 = vpop.eup %2054 }
 0xe78   : > { %v955_v23 = vadd.f32 1.0, %v2055_v22 }
 0xe7a   : > { %979 = vperm.xlu0 %2011, %v977_v20   ;;  %2056 = vrcp.f32 %v955_v23 }
 0xe87   : > { %v2057_v24 = vpop.eup %2056 }
 0xe88   : > { %v959_v28 = vmul.f32 %v2057_v24, %v873_v27 }
 0xee8   : > { %v962_v25 = vpop.permute.xlu0 %961 }
 0xee9   : > { %v964_v26 = vmul.f32 %v2057_v24, %v962_v25 }
 0xeeb   : > { %966 = vrot.lane.b32.xlu1 %v964_v26, %s2135_s28 }
 0xef5   : > { %v980_v32 = vpop.permute.xlu0 %979 }
 0xef6   : > { %vm981_vm13 = vcmp.eq.s32.totalorder %v980_v32, 1 }
 0xf5d   : > { %v967_v29 = vpop.permute.xlu1 %966 }
 0xf5e   : > { %v969_v30 = vadd.f32 %v967_v29, %v959_v28  ;;  %v1307_v29 = vsel %vm1306_vm4, 1, %v2134_v18 }
 0xf60   : > { %2058 = vtanh.f32 %v969_v30  ;;  %v983_v49 = vsel %vm981_vm13, %v969_v30, %v873_v27 }
 0xf6d   : > { %v2059_v31 = vpop.eup %2058 }
 0xf6e   : > { %972 = vrot.lane.b32.xlu1 %v2059_v31, %s2135_s28 }
 0xfe0   : > { %v973_v33 = vpop.permute.xlu1 %972 }
 0xfe1   : > { %v975_v34 = vmul.f32 %v2057_v24, %v973_v33  ;;  %v1771_v24 = vld [vmem:[%s2278_s22 + $0x40] sm:$0xff] }
 0xfe3   : > { %v982_v35 = vsel %vm981_vm13, %v975_v34, %v872_v6 }
 0xfe4   : > { %987 = vrot.lane.b32.xlu0 %v982_v35, %s2136_s20 }
0x1056   : > { %v988_v36 = vpop.permute.xlu0 %987 }
0x1057   : > { %1922 = vmatmul.mubr.msk.f32.vlgmr.msra.gmra.mxu0 %vm327_vm3, %v988_v36 }
0x1058   : > { %1936 = vmatpush3.msra.mxu0 %v2209_v13  ;;  %1943 = vmatprep.mubr.msk.f32.mxu0 %vm2133_vm0, %v2132_v14 }
0x1059   : > { %1937 = vmatprep.subr.mxu0 %v2132_v14 }
0x105a   : > { %1938 = vmatpush3.msra.mxu0 %v2215_v15 }
0x105b   : > { %1939 = vmatprep.subr.mxu0 %v2132_v14 }
0x105c   : > { %1940 = vmatpush3.msra.mxu0 %v2225_v16 }
0x105d   : > { %1941 = vmatprep.subr.mxu0 %v2132_v14 }
0x105e   : > { %1942 = vmatpush3.msra.mxu0 %v2234_v17 }
0x105f   : > { %1957 = vmatprep.subr.mxu0 %v2132_v14 }
0x1117   : > { %v1057_v38 = vpop.f32.mrf.mxu0 }
0x1118   : > { %v1061_v39 = vadd.f32 %v1765_v37, %v1057_v38 }
0x1119   : > { %v1923_v40 = vpop.f32.mrf.mxu0 }
0x111a   : > { %2060 = vtanh.f32 %v1061_v39  ;;  %v1767_v43 = vmul.f32 -1.442695, %v1061_v39 }
0x111c   : > { %2062 = vpow2.f32 %v1767_v43 }
0x1127   : > { %v2061_v41 = vpop.eup %2060 }
0x1128   : > { %1071 = vrot.lane.b32.xlu1 %v2061_v41, %s2135_s28 }
0x1129   : > { %v2063_v44 = vpop.eup %2062 }
0x112a   : > { %v1065_v45 = vadd.f32 1.0, %v2063_v44 }
0x112c   : > { %1089 = vperm.xlu1 %2010, %v1087_v42   ;;  %2064 = vrcp.f32 %v1065_v45 }
0x1139   : > { %v2065_v46 = vpop.eup %2064 }
0x113a   : > { %v1069_v50 = vmul.f32 %v2065_v46, %v983_v49 }
0x119a   : > { %v1072_v47 = vpop.permute.xlu1 %1071 }
0x119b   : > { %v1074_v48 = vmul.f32 %v2065_v46, %v1072_v47 }
0x119d   : > { %1076 = vrot.lane.b32.xlu0 %v1074_v48, %s2135_s28 }
0x11a7   : > { %v1090_v54 = vpop.permute.xlu1 %1089 }
0x11a8   : > { %vm1091_vm15 = vcmp.eq.s32.totalorder %v1090_v54, 1 }
0x120f   : > { %v1077_v51 = vpop.permute.xlu0 %1076 }
0x1210   : > { %v1079_v52 = vadd.f32 %v1077_v51, %v1069_v50 }
0x1212   : > { %2066 = vtanh.f32 %v1079_v52  ;;  %v1093_v7 = vsel %vm1091_vm15, %v1079_v52, %v983_v49 }
0x121f   : > { %v2067_v53 = vpop.eup %2066 }
0x1220   : > { %1082 = vrot.lane.b32.xlu0 %v2067_v53, %s2135_s28 }
0x1292   : > { %v1083_v55 = vpop.permute.xlu0 %1082 }
0x1293   : > { %v1085_v56 = vmul.f32 %v2065_v46, %v1083_v55  ;;  %v1774_v46 = vld [vmem:[%s2278_s22 + $0x48] sm:$0xff] }
0x1295   : > { %v1092_v57 = vsel %vm1091_vm15, %v1085_v56, %v982_v35 }
0x1296   : > { %1097 = vrot.lane.b32.xlu1 %v1092_v57, %s2136_s20 }
0x1308   : > { %v1098_v58 = vpop.permute.xlu1 %1097 }
0x1309   : > { %1933 = vmatmul.mubr.msk.f32.vlgmr.msra.gmra.mxu1 %vm327_vm3, %v1098_v58 }
0x130a   : > { %1947 = vmatpush3.msra.mxu1 %v2209_v13  ;;  %1954 = vmatprep.mubr.msk.f32.mxu1 %vm2133_vm0, %v2132_v14 }
0x130b   : > { %1948 = vmatprep.subr.mxu1 %v2132_v14 }
0x130c   : > { %1949 = vmatpush3.msra.mxu1 %v2215_v15 }
0x130d   : > { %1950 = vmatprep.subr.mxu1 %v2132_v14 }
0x130e   : > { %1951 = vmatpush3.msra.mxu1 %v2225_v16 }
0x130f   : > { %1952 = vmatprep.subr.mxu1 %v2132_v14 }
0x1310   : > { %1953 = vmatpush3.msra.mxu1 %v2234_v17 }
0x1311   : > { %1968 = vmatprep.subr.mxu1 %v2132_v14 }
0x13c9   : > { %v1167_v60 = vpop.f32.mrf.mxu1 }
0x13ca   : > { %v1171_v61 = vadd.f32 %v1768_v59, %v1167_v60 }
0x13cb   : > { %v1934_v62 = vpop.f32.mrf.mxu1 }
0x13cc   : > { %2068 = vtanh.f32 %v1171_v61  ;;  %v1770_v1 = vmul.f32 -1.442695, %v1171_v61 }
0x13ce   : > { %2070 = vpow2.f32 %v1770_v1 }
0x13d9   : > { %v2069_v63 = vpop.eup %2068 }
0x13da   : > { %1181 = vrot.lane.b32.xlu0 %v2069_v63, %s2135_s28  ;;  %v1777_v63 = vld [vmem:[%s2278_s22 + $0x50] sm:$0xff] }
0x13db   : > { %v2071_v2 = vpop.eup %2070 }
0x13dc   : > { %v1175_v3 = vadd.f32 1.0, %v2071_v2 }
0x13de   : > { %1199 = vperm.xlu0 %2011, %v1197_v0   ;;  %2072 = vrcp.f32 %v1175_v3 }
0x13eb   : > { %v2073_v4 = vpop.eup %2072 }
0x13ec   : > { %v1179_v8 = vmul.f32 %v2073_v4, %v1093_v7 }
0x144c   : > { %v1182_v5 = vpop.permute.xlu0 %1181 }
0x144d   : > { %v1184_v6 = vmul.f32 %v2073_v4, %v1182_v5 }
0x144f   : > { %1186 = vrot.lane.b32.xlu1 %v1184_v6, %s2135_s28 }
0x1459   : > { %v1200_v12 = vpop.permute.xlu0 %1199 }
0x145a   : > { %vm1201_vm2 = vcmp.eq.s32.totalorder %v1200_v12, 1 }
0x14c1   : > { %v1187_v9 = vpop.permute.xlu1 %1186 }
0x14c2   : > { %v1189_v10 = vadd.f32 %v1187_v9, %v1179_v8 }
0x14c4   : > { %2074 = vtanh.f32 %v1189_v10  ;;  %v1203_v36 = vsel %vm1201_vm2, %v1189_v10, %v1093_v7 }
0x14d1   : > { %v2075_v11 = vpop.eup %2074 }
0x14d2   : > { %1192 = vrot.lane.b32.xlu1 %v2075_v11, %s2135_s28 }
0x1544   : > { %v1193_v20 = vpop.permute.xlu1 %1192 }
0x1545   : > { %v1195_v21 = vmul.f32 %v2073_v4, %v1193_v20  ;;  %v1527_v4 = vsel %vm1526_vm7, 1, %v2134_v18 }
0x1547   : > { %v1202_v22 = vsel %vm1201_vm2, %v1195_v21, %v1092_v57 }
0x1548   : > { %1207 = vrot.lane.b32.xlu0 %v1202_v22, %s2136_s20 }
0x15ba   : > { %v1208_v23 = vpop.permute.xlu0 %1207 }
0x15bb   : > { %1944 = vmatmul.mubr.msk.f32.vlgmr.msra.gmra.mxu0 %vm327_vm3, %v1208_v23 }
0x15bc   : > { %1958 = vmatpush3.msra.mxu0 %v2209_v13  ;;  %1965 = vmatprep.mubr.msk.f32.mxu0 %vm2133_vm0, %v2132_v14 }
0x15bd   : > { %1959 = vmatprep.subr.mxu0 %v2132_v14 }
0x15be   : > { %1960 = vmatpush3.msra.mxu0 %v2215_v15 }
0x15bf   : > { %1961 = vmatprep.subr.mxu0 %v2132_v14 }
0x15c0   : > { %1962 = vmatpush3.msra.mxu0 %v2225_v16 }
0x15c1   : > { %1963 = vmatprep.subr.mxu0 %v2132_v14 }
0x15c2   : > { %1964 = vmatpush3.msra.mxu0 %v2234_v17 }
0x167b   : > { %v1277_v25 = vpop.f32.mrf.mxu0 }
0x167c   : > { %v1281_v26 = vadd.f32 %v1771_v24, %v1277_v25 }
0x167d   : > { %v1945_v27 = vpop.f32.mrf.mxu0 }
0x167e   : > { %2076 = vtanh.f32 %v1281_v26  ;;  %v1773_v30 = vmul.f32 -1.442695, %v1281_v26 }
0x1680   : > { %2078 = vpow2.f32 %v1773_v30 }
0x168b   : > { %v2077_v28 = vpop.eup %2076 }
0x168c   : > { %1291 = vrot.lane.b32.xlu1 %v2077_v28, %s2135_s28  ;;  %v1780_v28 = vld [vmem:[%s2278_s22 + $0x58] sm:$0xff] }
0x168d   : > { %v2079_v31 = vpop.eup %2078 }
0x168e   : > { %v1285_v32 = vadd.f32 1.0, %v2079_v31 }
0x1690   : > { %1309 = vperm.xlu1 %2010, %v1307_v29   ;;  %2080 = vrcp.f32 %v1285_v32 }
0x169d   : > { %v2081_v33 = vpop.eup %2080 }
0x169e   : > { %v1289_v37 = vmul.f32 %v2081_v33, %v1203_v36 }
0x16fe   : > { %v1292_v34 = vpop.permute.xlu1 %1291 }
0x16ff   : > { %v1294_v35 = vmul.f32 %v2081_v33, %v1292_v34 }
0x1701   : > { %1296 = vrot.lane.b32.xlu0 %v1294_v35, %s2135_s28 }
0x170b   : > { %v1310_v41 = vpop.permute.xlu1 %1309 }
0x170c   : > { %vm1311_vm5 = vcmp.eq.s32.totalorder %v1310_v41, 1 }
0x1773   : > { %v1297_v38 = vpop.permute.xlu0 %1296 }
0x1774   : > { %v1299_v39 = vadd.f32 %v1297_v38, %v1289_v37 }
0x1776   : > { %2082 = vtanh.f32 %v1299_v39  ;;  %v1313_v53 = vsel %vm1311_vm5, %v1299_v39, %v1203_v36 }
0x1783   : > { %v2083_v40 = vpop.eup %2082 }
0x1784   : > { %1302 = vrot.lane.b32.xlu0 %v2083_v40, %s2135_s28 }
0x17f6   : > { %v1303_v42 = vpop.permute.xlu0 %1302 }
0x17f7   : > { %v1305_v43 = vmul.f32 %v2081_v33, %v1303_v42  ;;  %v1637_v33 = vsel %vm1636_vm9, 1, %v2134_v18 }
0x17f9   : > { %v1312_v44 = vsel %vm1311_vm5, %v1305_v43, %v1202_v22 }
0x17fa   : > { %1317 = vrot.lane.b32.xlu1 %v1312_v44, %s2136_s20 }
0x186c   : > { %v1318_v45 = vpop.permute.xlu1 %1317 }
0x186d   : > { %1955 = vmatmul.mubr.msk.f32.vlgmr.msra.gmra.mxu1 %vm327_vm3, %v1318_v45 }
0x186e   : > { %1969 = vmatpush3.msra.mxu1 %v2209_v13  ;;  %1976 = vmatprep.mubr.msk.f32.mxu1 %vm2133_vm0, %v2132_v14 }
0x186f   : > { %1970 = vmatprep.subr.mxu1 %v2132_v14 }
0x1870   : > { %1971 = vmatpush3.msra.mxu1 %v2215_v15  ;;  %v1417_v15 = vsel %vm1416_vm6, 1, %v2134_v18 }
0x1871   : > { %1972 = vmatprep.subr.mxu1 %v2132_v14 }
0x1872   : > { %1973 = vmatpush3.msra.mxu1 %v2225_v16 }
0x1873   : > { %1974 = vmatprep.subr.mxu1 %v2132_v14 }
0x1874   : > { %1975 = vmatpush3.msra.mxu1 %v2234_v17 }
0x192d   : > { %v1387_v47 = vpop.f32.mrf.mxu1 }
0x192e   : > { %v1391_v48 = vadd.f32 %v1774_v46, %v1387_v47 }
0x192f   : > { %v1956_v49 = vpop.f32.mrf.mxu1 }
0x1930   : > { %2084 = vtanh.f32 %v1391_v48  ;;  %v1776_v50 = vmul.f32 -1.442695, %v1391_v48 }
0x1932   : > { %2086 = vpow2.f32 %v1776_v50  ;;  %v1784_v50 = vld [vmem:[#allocation2] ss:$0 sm:$0xff] }
0x193d   : > { %v2085_v13 = vpop.eup %2084 }
0x193e   : > { %1401 = vrot.lane.b32.xlu0 %v2085_v13, %s2135_s28 }
0x193f   : > { %v2087_v16 = vpop.eup %2086 }
0x1940   : > { %v1395_v51 = vadd.f32 1.0, %v2087_v16 }
0x1942   : > { %1419 = vperm.xlu0 %2011, %v1417_v15   ;;  %2088 = vrcp.f32 %v1395_v51 }
0x194f   : > { %v2089_v14 = vpop.eup %2088 }
0x1950   : > { %v1399_v54 = vmul.f32 %v2089_v14, %v1313_v53 }
0x19b0   : > { %v1402_v17 = vpop.permute.xlu0 %1401 }
0x19b1   : > { %v1404_v52 = vmul.f32 %v2089_v14, %v1402_v17 }
0x19b3   : > { %1406 = vrot.lane.b32.xlu1 %v1404_v52, %s2135_s28 }
0x19bd   : > { %v1420_v58 = vpop.permute.xlu0 %1419 }
0x19be   : > { %vm1421_vm0 = vcmp.eq.s32.totalorder %v1420_v58, 1 }
0x1a25   : > { %v1407_v55 = vpop.permute.xlu1 %1406 }
0x1a26   : > { %v1409_v56 = vadd.f32 %v1407_v55, %v1399_v54 }
0x1a28   : > { %2090 = vtanh.f32 %v1409_v56  ;;  %v1423_v11 = vsel %vm1421_vm0, %v1409_v56, %v1313_v53 }
0x1a35   : > { %v2091_v57 = vpop.eup %2090 }
0x1a36   : > { %1412 = vrot.lane.b32.xlu1 %v2091_v57, %s2135_s28 }
0x1aa8   : > { %v1413_v59 = vpop.permute.xlu1 %1412 }
0x1aa9   : > { %v1415_v60 = vmul.f32 %v2089_v14, %v1413_v59 }
0x1aab   : > { %v1422_v61 = vsel %vm1421_vm0, %v1415_v60, %v1312_v44 }
0x1aac   : > { %1427 = vrot.lane.b32.xlu0 %v1422_v61, %s2136_s20 }
0x1b1e   : > { %v1428_v62 = vpop.permute.xlu0 %1427 }
0x1b1f   : > { %1966 = vmatmul.mubr.msk.f32.vlgmr.msra.gmra.mxu0 %vm327_vm3, %v1428_v62 }
0x1bdf   : > { %v1497_v0 = vpop.f32.mrf.mxu0 }
0x1be0   : > { %v1501_v1 = vadd.f32 %v1777_v63, %v1497_v0 }
0x1be1   : > { %v1967_v2 = vpop.f32.mrf.mxu0 }
0x1be2   : > { %2092 = vtanh.f32 %v1501_v1  ;;  %v1779_v5 = vmul.f32 -1.442695, %v1501_v1 }
0x1be4   : > { %2094 = vpow2.f32 %v1779_v5 }
0x1bef   : > { %v2093_v3 = vpop.eup %2092 }
0x1bf0   : > { %1511 = vrot.lane.b32.xlu1 %v2093_v3, %s2135_s28 }
0x1bf1   : > { %v2095_v6 = vpop.eup %2094 }
0x1bf2   : > { %v1505_v7 = vadd.f32 1.0, %v2095_v6 }
0x1bf4   : > { %1529 = vperm.xlu1 %2010, %v1527_v4   ;;  %2096 = vrcp.f32 %v1505_v7 }
0x1c01   : > { %v2097_v8 = vpop.eup %2096 }
0x1c02   : > { %v1509_v12 = vmul.f32 %v2097_v8, %v1423_v11 }
0x1c62   : > { %v1512_v9 = vpop.permute.xlu1 %1511 }
0x1c63   : > { %v1514_v10 = vmul.f32 %v2097_v8, %v1512_v9 }
0x1c65   : > { %1516 = vrot.lane.b32.xlu0 %v1514_v10, %s2135_s28 }
0x1c6f   : > { %v1530_v23 = vpop.permute.xlu1 %1529 }
0x1c70   : > { %vm1531_vm8 = vcmp.eq.s32.totalorder %v1530_v23, 1 }
0x1cd7   : > { %v1517_v20 = vpop.permute.xlu0 %1516 }
0x1cd8   : > { %v1519_v21 = vadd.f32 %v1517_v20, %v1509_v12 }
0x1cda   : > { %2098 = vtanh.f32 %v1519_v21  ;;  %v1533_v40 = vsel %vm1531_vm8, %v1519_v21, %v1423_v11 }
0x1ce7   : > { %v2099_v22 = vpop.eup %2098 }
0x1ce8   : > { %1522 = vrot.lane.b32.xlu0 %v2099_v22, %s2135_s28 }
0x1d5a   : > { %v1523_v24 = vpop.permute.xlu0 %1522 }
0x1d5b   : > { %v1525_v25 = vmul.f32 %v2097_v8, %v1523_v24 }
0x1d5d   : > { %v1532_v26 = vsel %vm1531_vm8, %v1525_v25, %v1422_v61 }
0x1d5e   : > { %1537 = vrot.lane.b32.xlu1 %v1532_v26, %s2136_s20 }
0x1dd0   : > { %v1538_v27 = vpop.permute.xlu1 %1537 }
0x1dd1   : > { %1977 = vmatmul.mubr.msk.f32.vlgmr.msra.gmra.mxu1 %vm327_vm3, %v1538_v27 }
0x1e91   : > { %v1607_v29 = vpop.f32.mrf.mxu1 }
0x1e92   : > { %v1611_v30 = vadd.f32 %v1780_v28, %v1607_v29 }
0x1e93   : > { %v1978_v31 = vpop.f32.mrf.mxu1 }
0x1e94   : > { %2100 = vtanh.f32 %v1611_v30  ;;  %v1782_v34 = vmul.f32 -1.442695, %v1611_v30 }
0x1e96   : > { %2102 = vpow2.f32 %v1782_v34 }
0x1ea1   : > { %v2101_v32 = vpop.eup %2100 }
0x1ea2   : > { %1621 = vrot.lane.b32.xlu0 %v2101_v32, %s2135_s28 }
0x1ea3   : > { %v2103_v35 = vpop.eup %2102 }
0x1ea4   : > { %v1615_v36 = vadd.f32 1.0, %v2103_v35 }
0x1ea6   : > { %1639 = vperm.xlu0 %2011, %v1637_v33   ;;  %2104 = vrcp.f32 %v1615_v36 }
0x1eaa   : > { %1649 = vrot.lane.b32.xlu0 %v1783_v19, %s2136_s20 }
0x1eb3   : > { %v2105_v37 = vpop.eup %2104 }
0x1eb4   : > { %v1619_v18 = vmul.f32 %v2105_v37, %v1533_v40 }
0x1f14   : > { %v1622_v38 = vpop.permute.xlu0 %1621 }
0x1f15   : > { %v1624_v39 = vmul.f32 %v2105_v37, %v1622_v38 }
0x1f17   : > { %1626 = vrot.lane.b32.xlu1 %v1624_v39, %s2135_s28 }
0x1f21   : > { %v1640_v44 = vpop.permute.xlu0 %1639 }
0x1f22   : > { %vm1641_vm10 = vcmp.eq.s32.totalorder %v1640_v44, 1 }
0x1f25   : > { %v1650_v47 = vpop.permute.xlu0 %1649 }
0x1f89   : > { %v1627_v41 = vpop.permute.xlu1 %1626 }
0x1f8a   : > { %v1629_v42 = vadd.f32 %v1627_v41, %v1619_v18 }
0x1f8c   : > { %2106 = vtanh.f32 %v1629_v42 }
0x1f99   : > { %v2107_v43 = vpop.eup %2106 }
0x1f9a   : > { %1632 = vrot.lane.b32.xlu1 %v2107_v43, %s2135_s28 }
0x200c   : > { %v1633_v45 = vpop.permute.xlu1 %1632 }
0x200d   : > { %v1635_v46 = vmul.f32 %v2105_v37, %v1633_v45 }
0x200f   : > { %v1642_v48 = vsel %vm1641_vm10, %v1635_v46, %v1532_v26 }
0x2010   : > { %v1652_v49 = vmul.f32 %v1650_v47, %v1642_v48 }
0x2012   : > { %1654 = vrot.lane.b32.xlu1 %v1652_v49, %s2136_s20 }
0x2084   : > { %v1655_v13 = vpop.permute.xlu1 %1654 }
0x2085   : > { %v1657_v15 = vsel %vm327_vm3, %v1655_v13, 0.0 }
0x2086   : > { %1658 = vadd.xlane.f32.xlu0 %v1657_v15 }
0x210f   : > { %v1659_v16 = vpop.xlane.xlu0 %1658 }
0x2110   : > { %v1667_v51 = vadd.f32 %v1784_v50, %v1659_v16 }
0x2112   : > { %1669 = vst.msk [vmem:[%s320_s8] sm:$0xff] %vm1668_vm11, %v1667_v51 }
0x2113 PF: > { %p14_p9 = scmp.ge.s32.totalorder %s2187_s23, 4   ;;  %s2509_s20 = smov %s2126_s21 }
0x2114   : > { %s2510_s21 = smov %s2196_s26  ;;  %s2511_s22 = smov %s2187_s23 }
0x2115   :  { %16 = sbr.rel (!%p14_p9) target bundleno = 5 (0x5), region = 127 }

</bundles_post_ra>
